<compile_context>
chip_gen: v5e
topology: v5e:2x2
jax: 0.10.0
libtpu: 0.0.40
codegen_flags: <defaults>
</compile_context>

<pallas_src>
import functools

import jax
import jax.numpy as jnp
from jax.experimental import pallas as pl
from jax.experimental.pallas import tpu as pltpu

LEAKY_SLOPE = 0.2
BN_EPS = 1e-5


def _leaky_relu(x, slope=LEAKY_SLOPE):
    # max(x, a*x) == LeakyReLU for 0 <= a <= 1: mul+max (2 VPU ops/vreg)
    # instead of mul+cmp+select.
    return jnp.maximum(x, slope * x)


def _round_up(a, b):
    return ((a + b - 1) // b) * b


def _choose_tile(hw, target):
    """Pixel tile: multiple of 128, close to `target`; prefer an exact divisor."""
    target = max(128, (target // 128) * 128)
    hw128 = _round_up(hw, 128)
    if hw128 <= target:
        return hw128
    # Exact multiple-of-128 divisor near the target avoids padding entirely.
    for t in range(target, max(target // 2, 128) - 1, -128):
        if hw % t == 0:
            return t
    return target  # no good divisor: wrapper pads HW up to a multiple of target


def _stats_kernel(x_ref, w1_ref, b1_ref, w2_ref, sum_ref, sq_ref):
    """Pass 1: conv1 -> lrelu -> conv2; accumulate per-channel sum / sumsq.

    x_ref:   [Cin, TP]   (N squeezed), pixels on lanes
    w1_ref:  [ndf, Cin]
    b1_ref:  [ndf, 1]
    w2_ref:  [2*ndf, ndf]
    sum_ref: [2*ndf, 1]  per-image accumulator (resident across the tile axis)
    sq_ref:  [2*ndf, 1]
    """
    @pl.when(pl.program_id(1) == 0)
    def _():
        sum_ref[...] = jnp.zeros_like(sum_ref)
        sq_ref[...] = jnp.zeros_like(sq_ref)

    cdt = w1_ref.dtype  # bf16 by default (f32 accumulation), f32 otherwise
    x = x_ref[...].astype(cdt)
    h1 = jnp.dot(w1_ref[...], x, preferred_element_type=jnp.float32)
    h1 = _leaky_relu(h1 + b1_ref[...])
    h2 = jnp.dot(w2_ref[...], h1.astype(cdt), preferred_element_type=jnp.float32)

    # f32 single-pass moments.  Zero-padded pixels (if any) contribute a
    # constant per-pixel vector that the wrapper subtracts analytically.
    sum_ref[...] += jnp.sum(h2, axis=1, keepdims=True)
    sq_ref[...] += jnp.sum(h2 * h2, axis=1, keepdims=True)


def _apply_kernel(x_ref, w1_ref, b1_ref, w2s_ref, shift_ref, w3_ref, o_ref):
    """Pass 2: conv1 -> lrelu -> (scale-folded) conv2 + shift -> lrelu -> conv3.

    w2s_ref:   [2*ndf, ndf]  (gamma * inv_std) already folded into W2
    shift_ref: [2*ndf, 1]    beta - mean * gamma * inv_std
    w3_ref:    [1, 2*ndf]    kept in f32
    o_ref:     [1, TP]       lane-dense output tile
    """
    cdt = w1_ref.dtype
    x = x_ref[...].astype(cdt)
    h1 = jnp.dot(w1_ref[...], x, preferred_element_type=jnp.float32)
    h1 = _leaky_relu(h1 + b1_ref[...])
    h2 = jnp.dot(w2s_ref[...], h1.astype(cdt), preferred_element_type=jnp.float32)
    h3 = _leaky_relu(h2 + shift_ref[...])
    # conv3 stays f32: casting the [2*ndf, TP] h3 to bf16 costs far more VPU
    # work than this tiny M=1 matmul saves on the (idle) MXU.
    out = jnp.dot(w3_ref[...], h3, preferred_element_type=jnp.float32)
    o_ref[...] = out.astype(o_ref.dtype)


def pixel_discriminator(x_nchw, params, *, use_bf16_matmul=True,
                        tile_pixels=8192,
                        vmem_limit_bytes=48 * 1024 * 1024):
    """x_nchw: [N, C, H, W] float32 -> [N, 1, H, W] float32."""
    N, C, H, W = x_nchw.shape
    HW = H * W
    w1, b1, w2, gamma, beta, w3 = params
    ndf = w1.shape[0]
    c2 = 2 * ndf

    if use_bf16_matmul:
        w1m = w1.astype(jnp.bfloat16)
        w2m = w2.astype(jnp.bfloat16)
    else:
        w1m, w2m = w1, w2

    tp = _choose_tile(HW, tile_pixels)
    hw_pad = _round_up(HW, tp)
    n_tiles = hw_pad // tp
    n_pad = hw_pad - HW

    x3 = x_nchw.reshape(N, C, HW)  # free reshape: NCHW is already channel-major
    if n_pad:
        x3 = jnp.pad(x3, ((0, 0), (0, 0), (0, n_pad)))

    x_spec = pl.BlockSpec((None, C, tp), lambda n, t: (n, 0, t))
    const = lambda shape: pl.BlockSpec(shape, lambda n, t: (0, 0))
    cparams = lambda sem: pltpu.CompilerParams(
        dimension_semantics=sem, vmem_limit_bytes=vmem_limit_bytes)

    # ---- Pass 1: global BN statistics.  Per-image accumulator slots so the N
    # axis can be sharded across TensorCores (megacore on v7x); the tiny
    # N-reduction runs in plain JAX below. ----
    s_n, ss_n = pl.pallas_call(
        _stats_kernel,
        out_shape=(jax.ShapeDtypeStruct((N, c2, 1), jnp.float32),
                   jax.ShapeDtypeStruct((N, c2, 1), jnp.float32)),
        grid=(N, n_tiles),
        in_specs=[x_spec, const((ndf, C)), const((ndf, 1)), const((c2, ndf))],
        out_specs=(pl.BlockSpec((None, c2, 1), lambda n, t: (n, 0, 0)),
                   pl.BlockSpec((None, c2, 1), lambda n, t: (n, 0, 0))),
        compiler_params=cparams(("parallel", "arbitrary")),
    )(x3, w1m, b1, w2m)

    s = jnp.sum(s_n, axis=0)    # [c2, 1]
    ss = jnp.sum(ss_n, axis=0)  # [c2, 1]

    # Subtract the (constant) contribution of zero-padded pixels, if any:
    # x = 0 -> h1 = lrelu(b1) -> h2 = W2 @ lrelu(b1), identical for every
    # padded pixel of every image.
    if n_pad:
        h1p = _leaky_relu(b1)
        if use_bf16_matmul:
            h1p = h1p.astype(jnp.bfloat16).astype(jnp.float32)
        h2p = jnp.dot(w2m.astype(jnp.float32), h1p,
                      precision=jax.lax.Precision.HIGHEST)
        s = s - (N * n_pad) * h2p
        ss = ss - (N * n_pad) * (h2p * h2p)

    # Tiny per-channel post-processing on [c2, 1] arrays.
    count = float(N * HW)
    mean = s / count
    var = jnp.maximum(ss / count - mean * mean, 0.0)  # biased variance
    inv_std = jax.lax.rsqrt(var + BN_EPS)
    scale = gamma * inv_std
    shift = beta - mean * scale

    # Fold the BN scale into conv2's weight for pass 2: removes a full
    # [c2, TP] per-pixel multiply from the binding VPU slot.
    w2s = (scale * w2).astype(w2m.dtype)

    # ---- Pass 2: fused conv1 / conv2(+BN) / lrelu / conv3, fully parallel ----
    out3 = pl.pallas_call(
        _apply_kernel,
        out_shape=jax.ShapeDtypeStruct((N, 1, hw_pad), jnp.float32),
        grid=(N, n_tiles),
        in_specs=[x_spec, const((ndf, C)), const((ndf, 1)), const((c2, ndf)),
                  const((c2, 1)), const((1, c2))],
        out_specs=pl.BlockSpec((None, 1, tp), lambda n, t: (n, 0, t)),
        compiler_params=cparams(("parallel", "parallel")),
    )(x3, w1m, b1, w2s, shift, w3)

    if n_pad:
        out3 = out3[:, :, :HW]
    return out3.reshape(N, 1, H, W)


def init_params(key, input_nc, ndf):
    """Deterministic synthetic parameters in channel-first matmul layout."""
    k1, k2, k3, k4, k5, k6 = jax.random.split(key, 6)
    # PyTorch conv weight [Cout, Cin, 1, 1] squeezed to [Cout, Cin].
    w1 = 0.1 * jax.random.normal(k1, (ndf, input_nc), jnp.float32)
    b1 = 0.1 * jax.random.normal(k2, (ndf, 1), jnp.float32)
    w2 = 0.1 * jax.random.normal(k3, (2 * ndf, ndf), jnp.float32)
    gamma = 1.0 + 0.1 * jax.random.normal(k4, (2 * ndf, 1), jnp.float32)
    beta = 0.1 * jax.random.normal(k5, (2 * ndf, 1), jnp.float32)
    w3 = 0.1 * jax.random.normal(k6, (1, 2 * ndf), jnp.float32)
    return (w1, b1, w2, gamma, beta, w3)


def reference_forward(x_nchw, params):
    """Pure-JAX reference of the same forward pass (training-mode BatchNorm)."""
    N, C, H, W = x_nchw.shape
    w1, b1, w2, gamma, beta, w3 = params
    hp = jax.lax.Precision.HIGHEST
    x = x_nchw.reshape(N, C, H * W)
    h1 = _leaky_relu(jnp.einsum("oc,ncp->nop", w1, x, precision=hp) + b1[None])
    h2 = jnp.einsum("oc,ncp->nop", w2, h1, precision=hp)
    mean = jnp.mean(h2, axis=(0, 2), keepdims=True)
    var = jnp.mean((h2 - mean) ** 2, axis=(0, 2), keepdims=True)
    h2n = (h2 - mean) / jnp.sqrt(var + BN_EPS) * gamma[None] + beta[None]
    out = jnp.einsum("oc,ncp->nop", w3, _leaky_relu(h2n), precision=hp)
    return out.reshape(N, 1, H, W)


if __name__ == "__main__":
    key = jax.random.PRNGKey(0)
    k1, k2, k3, k4, k5, k6 = jax.random.split(key, 6)

    def run_case(shape, ndf, use_bf16, atol, rtol, kx, kp):
        n, c, h, w = shape
        x = jax.random.normal(kx, (n, c, h, w), jnp.float32)
        params = init_params(kp, c, ndf)
        fwd = jax.jit(functools.partial(pixel_discriminator,
                                        use_bf16_matmul=use_bf16))
        out = jax.block_until_ready(fwd(x, params))
        ref = reference_forward(x, params)
        assert out.shape == (n, 1, h, w), out.shape
        err = float(jnp.max(jnp.abs(out - ref)))
        assert jnp.allclose(out, ref, atol=atol, rtol=rtol), (
            f"mismatch vs reference (max abs err {err})")

    # f32 matmuls, exact-tile path (HW = 256).
    run_case((2, 4, 16, 16), 64, False, 1e-3, 1e-3, k1, k2)
    # bf16 matmuls (the default), looser tolerance vs the f32 reference.
    run_case((2, 4, 16, 16), 64, True, 1e-1, 1e-1, k3, k4)
    # Padded-tail path: HW = 100 -> tile 128 with 28 padded pixels corrected.
    run_case((2, 3, 10, 10), 64, False, 1e-3, 1e-3, k5, k6)

    print("KERNEL_OK")
</pallas_src>

<mosaic_0001>
module attributes {stable_mosaic.version = 11 : i64} {
  func.func @_stats_kernel(%arg0: i32, %arg1: i32, %arg2: memref<1x4x256xf32, #tpu.memory_space<vmem>>, %arg3: memref<64x4xf32, #tpu.memory_space<vmem>>, %arg4: memref<64x1xf32, #tpu.memory_space<vmem>>, %arg5: memref<128x64xf32, #tpu.memory_space<vmem>>, %arg6: memref<1x128x1xf32, #tpu.memory_space<vmem>>, %arg7: memref<1x128x1xf32, #tpu.memory_space<vmem>>) attributes {dimension_semantics = [#tpu.dimension_semantics<parallel>, #tpu.dimension_semantics<arbitrary>], iteration_bounds = array<i64: 2, 1>, scalar_prefetch = 0 : i64, scratch_operands = 0 : i64, tpu.core_type = #tpu.core_type<tc>, window_params = [{transform_indices = @transform_0, window_bounds = array<i64: 1, 4, 256>}, {pipeline_mode = #tpu.pipeline_mode<synchronous>, transform_indices = @transform_1, window_bounds = array<i64: 64, 4>}, {pipeline_mode = #tpu.pipeline_mode<synchronous>, transform_indices = @transform_2, window_bounds = array<i64: 64, 1>}, {pipeline_mode = #tpu.pipeline_mode<synchronous>, transform_indices = @transform_3, window_bounds = array<i64: 128, 64>}, {transform_indices = @transform_4, window_bounds = array<i64: 1, 128, 1>}, {transform_indices = @transform_5, window_bounds = array<i64: 1, 128, 1>}]} {
    %c0_i32 = arith.constant 0 : i32
    %0 = arith.cmpi eq, %arg1, %c0_i32 : i32
    %1 = arith.extui %0 : i1 to i32
    %c0_i32_0 = arith.constant 0 : i32
    %2 = arith.cmpi ne, %1, %c0_i32_0 : i32
    scf.if %2 {
      %cst_25 = arith.constant 0.000000e+00 : f32
      %32 = vector.broadcast %cst_25 : f32 to vector<128x1xf32>
      %c0_26 = arith.constant 0 : index
      %c0_27 = arith.constant 0 : index
      %c0_28 = arith.constant 0 : index
      %33 = vector.load %arg6[%c0_26, %c0_27, %c0_28] : memref<1x128x1xf32, #tpu.memory_space<vmem>>, vector<1x128x1xf32>
      %34 = vector.shape_cast %33 : vector<1x128x1xf32> to vector<128x1xf32>
      %35 = vector.shape_cast %32 : vector<128x1xf32> to vector<1x128x1xf32>
      tpu.vector_store %arg6[%c0_26, %c0_27, %c0_28], %35 {strides = array<i32>} : memref<1x128x1xf32, #tpu.memory_space<vmem>>, vector<1x128x1xf32>,
      %cst_29 = arith.constant 0.000000e+00 : f32
      %36 = vector.broadcast %cst_29 : f32 to vector<128x1xf32>
      %c0_30 = arith.constant 0 : index
      %c0_31 = arith.constant 0 : index
      %c0_32 = arith.constant 0 : index
      %37 = vector.load %arg7[%c0_30, %c0_31, %c0_32] : memref<1x128x1xf32, #tpu.memory_space<vmem>>, vector<1x128x1xf32>
      %38 = vector.shape_cast %37 : vector<1x128x1xf32> to vector<128x1xf32>
      %39 = vector.shape_cast %36 : vector<128x1xf32> to vector<1x128x1xf32>
      tpu.vector_store %arg7[%c0_30, %c0_31, %c0_32], %39 {strides = array<i32>} : memref<1x128x1xf32, #tpu.memory_space<vmem>>, vector<1x128x1xf32>,
    } else {
    }
    %c0 = arith.constant 0 : index
    %c0_1 = arith.constant 0 : index
    %c0_2 = arith.constant 0 : index
    %3 = vector.load %arg2[%c0, %c0_1, %c0_2] : memref<1x4x256xf32, #tpu.memory_space<vmem>>, vector<1x4x256xf32>
    %4 = vector.shape_cast %3 : vector<1x4x256xf32> to vector<4x256xf32>
    %c0_3 = arith.constant 0 : index
    %c0_4 = arith.constant 0 : index
    %5 = vector.load %arg3[%c0_3, %c0_4] : memref<64x4xf32, #tpu.memory_space<vmem>>, vector<64x4xf32>
    %cst = arith.constant dense<0.000000e+00> : vector<64x256xf32>
    %6 = tpu.matmul %5, %4, %cst {dimension_numbers = #tpu.dot_dimension_numbers<[1], [0], [0], [1], [0, 0, 1, 1], [], []>} : vector<64x4xf32>, vector<4x256xf32>, vector<64x256xf32> -> vector<64x256xf32>
    %c0_5 = arith.constant 0 : index
    %c0_6 = arith.constant 0 : index
    %7 = vector.load %arg4[%c0_5, %c0_6] : memref<64x1xf32, #tpu.memory_space<vmem>>, vector<64x1xf32>
    %8 = vector.broadcast %7 : vector<64x1xf32> to vector<64x256xf32>
    %9 = arith.addf %6, %8 : vector<64x256xf32>
    %cst_7 = arith.constant 2.000000e-01 : f32
    %10 = vector.broadcast %cst_7 : f32 to vector<64x256xf32>
    %11 = arith.mulf %10, %9 : vector<64x256xf32>
    %12 = arith.maximumf %9, %11 : vector<64x256xf32>
    %c0_8 = arith.constant 0 : index
    %c0_9 = arith.constant 0 : index
    %13 = vector.load %arg5[%c0_8, %c0_9] : memref<128x64xf32, #tpu.memory_space<vmem>>, vector<128x64xf32>
    %cst_10 = arith.constant dense<0.000000e+00> : vector<128x256xf32>
    %14 = tpu.matmul %13, %12, %cst_10 {dimension_numbers = #tpu.dot_dimension_numbers<[1], [0], [0], [1], [0, 0, 1, 1], [], []>} : vector<128x64xf32>, vector<64x256xf32>, vector<128x256xf32> -> vector<128x256xf32>
    %c0_11 = arith.constant 0 : index
    %c0_12 = arith.constant 0 : index
    %c0_13 = arith.constant 0 : index
    %15 = vector.load %arg6[%c0_11, %c0_12, %c0_13] : memref<1x128x1xf32, #tpu.memory_space<vmem>>, vector<1x128x1xf32>
    %16 = vector.shape_cast %15 : vector<1x128x1xf32> to vector<128x1xf32>
    %cst_14 = arith.constant dense<0.000000e+00> : vector<128xf32>
    %17 = vector.multi_reduction <add>, %14, %cst_14 [1] : vector<128x256xf32> to vector<128xf32>
    %18 = vector.shape_cast %17 : vector<128xf32> to vector<128x1xf32>
    %19 = arith.addf %16, %18 : vector<128x1xf32>
    %c0_15 = arith.constant 0 : index
    %c0_16 = arith.constant 0 : index
    %c0_17 = arith.constant 0 : index
    %20 = vector.load %arg6[%c0_15, %c0_16, %c0_17] : memref<1x128x1xf32, #tpu.memory_space<vmem>>, vector<1x128x1xf32>
    %21 = vector.shape_cast %20 : vector<1x128x1xf32> to vector<128x1xf32>
    %22 = vector.shape_cast %19 : vector<128x1xf32> to vector<1x128x1xf32>
    tpu.vector_store %arg6[%c0_15, %c0_16, %c0_17], %22 {strides = array<i32>} : memref<1x128x1xf32, #tpu.memory_space<vmem>>, vector<1x128x1xf32>,
    %c0_18 = arith.constant 0 : index
    %c0_19 = arith.constant 0 : index
    %c0_20 = arith.constant 0 : index
    %23 = vector.load %arg7[%c0_18, %c0_19, %c0_20] : memref<1x128x1xf32, #tpu.memory_space<vmem>>, vector<1x128x1xf32>
    %24 = vector.shape_cast %23 : vector<1x128x1xf32> to vector<128x1xf32>
    %25 = arith.mulf %14, %14 : vector<128x256xf32>
    %cst_21 = arith.constant dense<0.000000e+00> : vector<128xf32>
    %26 = vector.multi_reduction <add>, %25, %cst_21 [1] : vector<128x256xf32> to vector<128xf32>
    %27 = vector.shape_cast %26 : vector<128xf32> to vector<128x1xf32>
    %28 = arith.addf %24, %27 : vector<128x1xf32>
    %c0_22 = arith.constant 0 : index
    %c0_23 = arith.constant 0 : index
    %c0_24 = arith.constant 0 : index
    %29 = vector.load %arg7[%c0_22, %c0_23, %c0_24] : memref<1x128x1xf32, #tpu.memory_space<vmem>>, vector<1x128x1xf32>
    %30 = vector.shape_cast %29 : vector<1x128x1xf32> to vector<128x1xf32>
    %31 = vector.shape_cast %28 : vector<128x1xf32> to vector<1x128x1xf32>
    tpu.vector_store %arg7[%c0_22, %c0_23, %c0_24], %31 {strides = array<i32>} : memref<1x128x1xf32, #tpu.memory_space<vmem>>, vector<1x128x1xf32>,
    return
  }
  func.func @transform_0(%arg0: i32, %arg1: i32) -> (i32, i32, i32) {
    %c0_i32 = arith.constant 0 : i32
    %c0_i32_0 = arith.constant 0 : i32
    return %arg0, %c0_i32, %arg1 : i32, i32, i32
  }
  func.func @transform_1(%arg0: i32, %arg1: i32) -> (i32, i32) {
    %c0_i32 = arith.constant 0 : i32
    %c0_i32_0 = arith.constant 0 : i32
    %c0_i32_1 = arith.constant 0 : i32
    return %c0_i32, %c0_i32_0 : i32, i32
  }
  func.func @transform_2(%arg0: i32, %arg1: i32) -> (i32, i32) {
    %c0_i32 = arith.constant 0 : i32
    %c0_i32_0 = arith.constant 0 : i32
    %c0_i32_1 = arith.constant 0 : i32
    return %c0_i32, %c0_i32_0 : i32, i32
  }
  func.func @transform_3(%arg0: i32, %arg1: i32) -> (i32, i32) {
    %c0_i32 = arith.constant 0 : i32
    %c0_i32_0 = arith.constant 0 : i32
    %c0_i32_1 = arith.constant 0 : i32
    return %c0_i32, %c0_i32_0 : i32, i32
  }
  func.func @transform_4(%arg0: i32, %arg1: i32) -> (i32, i32, i32) {
    %c0_i32 = arith.constant 0 : i32
    %c0_i32_0 = arith.constant 0 : i32
    %c0_i32_1 = arith.constant 0 : i32
    return %arg0, %c0_i32, %c0_i32_0 : i32, i32, i32
  }
  func.func @transform_5(%arg0: i32, %arg1: i32) -> (i32, i32, i32) {
    %c0_i32 = arith.constant 0 : i32
    %c0_i32_0 = arith.constant 0 : i32
    %c0_i32_1 = arith.constant 0 : i32
    return %arg0, %c0_i32, %c0_i32_0 : i32, i32, i32
  }
}

module attributes {stable_mosaic.version = 11 : i64} {
  func.func @_apply_kernel(%arg0: i32, %arg1: i32, %arg2: memref<1x4x256xf32, #tpu.memory_space<vmem>>, %arg3: memref<64x4xf32, #tpu.memory_space<vmem>>, %arg4: memref<64x1xf32, #tpu.memory_space<vmem>>, %arg5: memref<128x64xf32, #tpu.memory_space<vmem>>, %arg6: memref<128x1xf32, #tpu.memory_space<vmem>>, %arg7: memref<1x128xf32, #tpu.memory_space<vmem>>, %arg8: memref<1x1x256xf32, #tpu.memory_space<vmem>>) attributes {dimension_semantics = [#tpu.dimension_semantics<parallel>, #tpu.dimension_semantics<parallel>], iteration_bounds = array<i64: 2, 1>, scalar_prefetch = 0 : i64, scratch_operands = 0 : i64, tpu.core_type = #tpu.core_type<tc>, window_params = [{transform_indices = @transform_0, window_bounds = array<i64: 1, 4, 256>}, {pipeline_mode = #tpu.pipeline_mode<synchronous>, transform_indices = @transform_1, window_bounds = array<i64: 64, 4>}, {pipeline_mode = #tpu.pipeline_mode<synchronous>, transform_indices = @transform_2, window_bounds = array<i64: 64, 1>}, {pipeline_mode = #tpu.pipeline_mode<synchronous>, transform_indices = @transform_3, window_bounds = array<i64: 128, 64>}, {pipeline_mode = #tpu.pipeline_mode<synchronous>, transform_indices = @transform_4, window_bounds = array<i64: 128, 1>}, {pipeline_mode = #tpu.pipeline_mode<synchronous>, transform_indices = @transform_5, window_bounds = array<i64: 1, 128>}, {transform_indices = @transform_6, window_bounds = array<i64: 1, 1, 256>}]} {
    %c0 = arith.constant 0 : index
    %c0_0 = arith.constant 0 : index
    %c0_1 = arith.constant 0 : index
    %0 = vector.load %arg2[%c0, %c0_0, %c0_1] : memref<1x4x256xf32, #tpu.memory_space<vmem>>, vector<1x4x256xf32>
    %1 = vector.shape_cast %0 : vector<1x4x256xf32> to vector<4x256xf32>
    %c0_2 = arith.constant 0 : index
    %c0_3 = arith.constant 0 : index
    %2 = vector.load %arg3[%c0_2, %c0_3] : memref<64x4xf32, #tpu.memory_space<vmem>>, vector<64x4xf32>
    %cst = arith.constant dense<0.000000e+00> : vector<64x256xf32>
    %3 = tpu.matmul %2, %1, %cst {dimension_numbers = #tpu.dot_dimension_numbers<[1], [0], [0], [1], [0, 0, 1, 1], [], []>} : vector<64x4xf32>, vector<4x256xf32>, vector<64x256xf32> -> vector<64x256xf32>
    %c0_4 = arith.constant 0 : index
    %c0_5 = arith.constant 0 : index
    %4 = vector.load %arg4[%c0_4, %c0_5] : memref<64x1xf32, #tpu.memory_space<vmem>>, vector<64x1xf32>
    %5 = vector.broadcast %4 : vector<64x1xf32> to vector<64x256xf32>
    %6 = arith.addf %3, %5 : vector<64x256xf32>
    %cst_6 = arith.constant 2.000000e-01 : f32
    %7 = vector.broadcast %cst_6 : f32 to vector<64x256xf32>
    %8 = arith.mulf %7, %6 : vector<64x256xf32>
    %9 = arith.maximumf %6, %8 : vector<64x256xf32>
    %c0_7 = arith.constant 0 : index
    %c0_8 = arith.constant 0 : index
    %10 = vector.load %arg5[%c0_7, %c0_8] : memref<128x64xf32, #tpu.memory_space<vmem>>, vector<128x64xf32>
    %cst_9 = arith.constant dense<0.000000e+00> : vector<128x256xf32>
    %11 = tpu.matmul %10, %9, %cst_9 {dimension_numbers = #tpu.dot_dimension_numbers<[1], [0], [0], [1], [0, 0, 1, 1], [], []>} : vector<128x64xf32>, vector<64x256xf32>, vector<128x256xf32> -> vector<128x256xf32>
    %c0_10 = arith.constant 0 : index
    %c0_11 = arith.constant 0 : index
    %12 = vector.load %arg6[%c0_10, %c0_11] : memref<128x1xf32, #tpu.memory_space<vmem>>, vector<128x1xf32>
    %13 = vector.broadcast %12 : vector<128x1xf32> to vector<128x256xf32>
    %14 = arith.addf %11, %13 : vector<128x256xf32>
    %cst_12 = arith.constant 2.000000e-01 : f32
    %15 = vector.broadcast %cst_12 : f32 to vector<128x256xf32>
    %16 = arith.mulf %15, %14 : vector<128x256xf32>
    %17 = arith.maximumf %14, %16 : vector<128x256xf32>
    %c0_13 = arith.constant 0 : index
    %c0_14 = arith.constant 0 : index
    %18 = vector.load %arg7[%c0_13, %c0_14] : memref<1x128xf32, #tpu.memory_space<vmem>>, vector<1x128xf32>
    %cst_15 = arith.constant dense<0.000000e+00> : vector<1x256xf32>
    %19 = tpu.matmul %18, %17, %cst_15 {dimension_numbers = #tpu.dot_dimension_numbers<[1], [0], [0], [1], [0, 0, 1, 1], [], []>} : vector<1x128xf32>, vector<128x256xf32>, vector<1x256xf32> -> vector<1x256xf32>
    %c0_16 = arith.constant 0 : index
    %c0_17 = arith.constant 0 : index
    %c0_18 = arith.constant 0 : index
    %20 = vector.load %arg8[%c0_16, %c0_17, %c0_18] : memref<1x1x256xf32, #tpu.memory_space<vmem>>, vector<1x1x256xf32>
    %21 = vector.shape_cast %20 : vector<1x1x256xf32> to vector<1x256xf32>
    %22 = vector.shape_cast %19 : vector<1x256xf32> to vector<1x1x256xf32>
    tpu.vector_store %arg8[%c0_16, %c0_17, %c0_18], %22 {strides = array<i32>} : memref<1x1x256xf32, #tpu.memory_space<vmem>>, vector<1x1x256xf32>,
    return
  }
  func.func @transform_0(%arg0: i32, %arg1: i32) -> (i32, i32, i32) {
    %c0_i32 = arith.constant 0 : i32
    %c0_i32_0 = arith.constant 0 : i32
    return %arg0, %c0_i32, %arg1 : i32, i32, i32
  }
  func.func @transform_1(%arg0: i32, %arg1: i32) -> (i32, i32) {
    %c0_i32 = arith.constant 0 : i32
    %c0_i32_0 = arith.constant 0 : i32
    %c0_i32_1 = arith.constant 0 : i32
    return %c0_i32, %c0_i32_0 : i32, i32
  }
  func.func @transform_2(%arg0: i32, %arg1: i32) -> (i32, i32) {
    %c0_i32 = arith.constant 0 : i32
    %c0_i32_0 = arith.constant 0 : i32
    %c0_i32_1 = arith.constant 0 : i32
    return %c0_i32, %c0_i32_0 : i32, i32
  }
  func.func @transform_3(%arg0: i32, %arg1: i32) -> (i32, i32) {
    %c0_i32 = arith.constant 0 : i32
    %c0_i32_0 = arith.constant 0 : i32
    %c0_i32_1 = arith.constant 0 : i32
    return %c0_i32, %c0_i32_0 : i32, i32
  }
  func.func @transform_4(%arg0: i32, %arg1: i32) -> (i32, i32) {
    %c0_i32 = arith.constant 0 : i32
    %c0_i32_0 = arith.constant 0 : i32
    %c0_i32_1 = arith.constant 0 : i32
    return %c0_i32, %c0_i32_0 : i32, i32
  }
  func.func @transform_5(%arg0: i32, %arg1: i32) -> (i32, i32) {
    %c0_i32 = arith.constant 0 : i32
    %c0_i32_0 = arith.constant 0 : i32
    %c0_i32_1 = arith.constant 0 : i32
    return %c0_i32, %c0_i32_0 : i32, i32
  }
  func.func @transform_6(%arg0: i32, %arg1: i32) -> (i32, i32, i32) {
    %c0_i32 = arith.constant 0 : i32
    %c0_i32_0 = arith.constant 0 : i32
    return %arg0, %c0_i32, %arg1 : i32, i32, i32
  }
}

</mosaic_0001>

<bundles_post_ra>
// kernel: pixel_discriminator.3
= control target key start
LH: loop header
LB: loop body
LE: loop exit
PB: predicated region body
PF: predicated region fallthrough
CT: control target
= control target key end

     0   :  { %s1147_s21 = smov 0   ;;  %s1149_s22 = smov 0   ;;  %s1430_s0 = inlined_call_operand.vmem [shape: f32[2,4,256], index: 0, kind: input, shape index: {}]   ;;  %s1431_s1 = inlined_call_operand.vmem [shape: f32[64,4], index: 1, kind: input, shape index: {}]   ;;  %s1432_s2 = inlined_call_operand.vmem [shape: f32[64,1], index: 2, kind: input, shape index: {}]   ;;  %s1433_s3 = inlined_call_operand.vmem [shape: f32[128,64], index: 3, kind: input, shape index: {}]   ;;  %s1434_s4 = inlined_call_operand.vmem [shape: f32[128,1], index: 4, kind: input, shape index: {}]   ;;  %s1435_s5 = inlined_call_operand.vmem [shape: f32[1,128], index: 5, kind: input, shape index: {}]   ;;  %s1436_s6 = inlined_call_operand.vmem [shape: f32[2,1,256], index: 6, kind: output, shape index: {}]  }
   0x1   :  { %s1151_s23 = smov 0  }
   0x2 LB: > { %s28_s24 = sadd.s32 1, %s1105_s22  ;;  %p986_p0 = scmp.ge.s32.totalorder %s1109_s23, 1  ;;  %s1109_s23 = sphi %s1151_s23, %s16_s23   ;;  %s1105_s22 = sphi %s1149_s22, %s1438_s22   ;;  %s1101_s21 = sphi %s1147_s21, %s1437_s21  }
   0x3   : > { %p30_p1 = scmp.ge.s32.totalorder %s28_s24, 2  ;;  %p233_p2 = scmp.lt.s32.totalorder %s1109_s23, 3 }
   0x5   : > { %s1440_s24 = smov (%p30_p1, %s28_s24), 0  ;;  %p234_p3 = pnand %p986_p0, %p233_p2 }
   0x6   : > { %p271_p4 = scmp.lt.s32.totalorder (!%p234_p3), %s1101_s21, 1 }
   0x7   : > { %237 = sbr.rel (%p234_p3) target bundleno = 617 (0x269), region = 44 }
   0xc   : > { %v303_v0 = vld [vmem:[%s1432_s2 + $0x28] sm:$0xff]  ;;  %v1111_v1 = vmov 0   ;;  %v305_v2 = vld [vmem:[%s1432_s2 + $0x38] sm:$0xff]  ;;  %s1442_s21 = smov (!%p271_p4, %s1101_s21), 1  ;;  %v302_v4 = vld [vmem:[%s1432_s2 + $0x20] sm:$0xff]  ;;  %vm375_vm0 = vcmask 1043456  }
   0xd   : > { %1085 = vset.pattern.permute.xlu1 %v1111_v1  ;;  %1084 = vset.pattern.permute.xlu0 %v1111_v1  ;;  %s1042_s29 = sshll.u32 %s1442_s21, 3  ;;  %v304_v5 = vld [vmem:[%s1432_s2 + $0x30] sm:$0xff]  ;;  %v290_v6 = vld [vmem:[%s1431_s1] sm:$0xff]  ;;  %vm350_vm1 = vcmask 31744   ;;  %v299_v10 = vld [vmem:[%s1432_s2 + $0x8] sm:$0xff]  ;;  %vm606_vm2 = vcmask 523264  }
   0xe   : > { %333 = vperm.xlu1 %1085, %v303_v0   ;;  %343 = vperm.xlu0 %1084, %v305_v2   ;;  %s278_s8 = scalar_lea.vmem %s1430_s0, %s1042_s29  ;;  %v298_v9 = vld [vmem:[%s1432_s2] sm:$0xff]  ;;  %v301_v11 = vld [vmem:[%s1432_s2 + $0x18] sm:$0xff]  ;;  %v291_v12 = vld [vmem:[%s1431_s1 + $0x8] sm:$0xff]  ;;  %s989_s27 = sshll.u32 %s1442_s21, 1  ;;  %vm893_vm3 = vcmask 1040384  }
   0xf   : > { %1086 = vset.pattern.permute.xlu2 %v1111_v1  ;;  %v289_v3 = vld [vmem:[%s278_s8] sm:$0xff]  ;;  %v524_v13 = vld [vmem:[%s1434_s4 + $0x70] sm:$0xff]  ;;  %v523_v14 = vld [vmem:[%s1434_s4 + $0x68] sm:$0xff]  ;;  %s287_s30 = scalar_lea.vmem %s1436_s6, %s989_s27 }
  0x10   : > { %347 = vst [vmem:[#allocation1] ss:$2 sm:$0xff] %v289_v3  ;;  %323 = vperm.xlu2 %1086, %v301_v11   ;;  %v300_v15 = vld [vmem:[%s1432_s2 + $0x10] sm:$0xff]  ;;  %v521_v17 = vld [vmem:[%s1434_s4 + $0x58] sm:$0xff]  ;;  %v518_v21 = vld [vmem:[%s1434_s4 + $0x40] sm:$0xff] }
  0x11   : > { %v292_v16 = vld [vmem:[%s1431_s1 + $0x10] sm:$0xff]  ;;  %v525_v19 = vld [vmem:[%s1434_s4 + $0x78] sm:$0xff]  ;;  %v522_v23 = vld [vmem:[%s1434_s4 + $0x60] sm:$0xff] }
  0x12   : > { %v520_v18 = vld [vmem:[%s1434_s4 + $0x50] sm:$0xff]  ;;  %v293_v20 = vld [vmem:[%s1431_s1 + $0x18] sm:$0xff]  ;;  %v294_v24 = vld [vmem:[%s1431_s1 + $0x20] sm:$0xff] }
  0x13   : > { %v517_v22 = vld [vmem:[%s1434_s4 + $0x38] sm:$0xff]  ;;  %v519_v25 = vld [vmem:[%s1434_s4 + $0x48] sm:$0xff]  ;;  %v514_v27 = vld [vmem:[%s1434_s4 + $0x20] sm:$0xff] }
  0x14   : > { %v515_v26 = vld [vmem:[%s1434_s4 + $0x28] sm:$0xff]  ;;  %v516_v29 = vld [vmem:[%s1434_s4 + $0x30] sm:$0xff]  ;;  %v513_v33 = vld [vmem:[%s1434_s4 + $0x18] sm:$0xff] }
  0x15   : > { %v295_v28 = vld [vmem:[%s1431_s1 + $0x28] sm:$0xff]  ;;  %v512_v30 = vld [vmem:[%s1434_s4 + $0x10] sm:$0xff]  ;;  %v297_v34 = vld [vmem:[%s1431_s1 + $0x38] sm:$0xff] }
  0x16   : > { %328 = vperm.xlu1 %1085, %v302_v4   ;;  %338 = vperm.xlu0 %1084, %v304_v5   ;;  %v511_v31 = vld [vmem:[%s1434_s4 + $0x8] sm:$0xff]  ;;  %v296_v32 = vld [vmem:[%s1431_s1 + $0x30] sm:$0xff]  ;;  %v510_v35 = vld [vmem:[%s1434_s4] sm:$0xff] }
  0x17   : > { %v348_v7 = vld.sshfl [vmem:[#allocation1] sm:$0xff pattern:$0x75316420]  ;;  %v349_v8 = vld.sshfl [vmem:[#allocation1 + $0x8] sm:$0xff pattern:$0x75316420] }
  0x18   : > { %990 = vmatpush.msk.msra.mxu0 %vm375_vm0, %v348_v7  ;;  %999 = vmatpush.msk.msra.mxu1 %vm375_vm0, %v349_v8 }
  0x19   : > { %991 = vmatmul.msk.f32.vlgmr.msra.gmra.mxu0 %vm350_vm1, %v290_v6  ;;  %1000 = vmatmul.msk.f32.vlgmr.msra.gmra.mxu1 %vm350_vm1, %v290_v6 }
  0x1a   : > { %318 = vperm.xlu2 %1086, %v300_v15  }
  0x1e   : > { %308 = vperm.xlu1 %1085, %v298_v9   ;;  %313 = vperm.xlu0 %1084, %v299_v10  }
  0x21   : > { %992 = vmatmul.msk.f32.gmra.mxu0 %vm350_vm1, %v291_v12  ;;  %1001 = vmatmul.msk.f32.gmra.mxu1 %vm350_vm1, %v291_v12 }
  0x22   : > { %603 = vperm.xlu2 %1086, %v525_v19  }
  0x26   : > { %598 = vperm.xlu0 %1084, %v524_v13   ;;  %593 = vperm.xlu1 %1085, %v523_v14  }
  0x29   : > { %993 = vmatmul.msk.f32.gmra.mxu0 %vm350_vm1, %v292_v16  ;;  %1002 = vmatmul.msk.f32.gmra.mxu1 %vm350_vm1, %v292_v16 }
  0x2a   : > { %588 = vperm.xlu2 %1086, %v522_v23  }
  0x2e   : > { %583 = vperm.xlu0 %1084, %v521_v17   ;;  %578 = vperm.xlu1 %1085, %v520_v18  }
  0x31   : > { %994 = vmatmul.msk.f32.gmra.mxu0 %vm350_vm1, %v293_v20  ;;  %1003 = vmatmul.msk.f32.gmra.mxu1 %vm350_vm1, %v293_v20 }
  0x32   : > { %573 = vperm.xlu2 %1086, %v519_v25  }
  0x36   : > { %568 = vperm.xlu0 %1084, %v518_v21   ;;  %563 = vperm.xlu1 %1085, %v517_v22  }
  0x39   : > { %995 = vmatmul.msk.f32.gmra.mxu0 %vm350_vm1, %v294_v24  ;;  %1004 = vmatmul.msk.f32.gmra.mxu1 %vm350_vm1, %v294_v24 }
  0x3a   : > { %558 = vperm.xlu2 %1086, %v516_v29  }
  0x3e   : > { %553 = vperm.xlu0 %1084, %v515_v26   ;;  %548 = vperm.xlu1 %1085, %v514_v27  }
  0x41   : > { %996 = vmatmul.msk.f32.gmra.mxu0 %vm350_vm1, %v295_v28  ;;  %1005 = vmatmul.msk.f32.gmra.mxu1 %vm350_vm1, %v295_v28 }
  0x42   : > { %543 = vperm.xlu2 %1086, %v513_v33  }
  0x46   : > { %538 = vperm.xlu0 %1084, %v512_v30   ;;  %533 = vperm.xlu1 %1085, %v511_v31  }
  0x49   : > { %997 = vmatmul.msk.f32.gmra.mxu0 %vm350_vm1, %v296_v32  ;;  %1006 = vmatmul.msk.f32.gmra.mxu1 %vm350_vm1, %v296_v32 }
  0x4a   : > { %528 = vperm.xlu2 %1086, %v510_v35  }
  0x51   : > { %998 = vmatmul.msk.f32.gmra.mxu0 %vm350_vm1, %v297_v34  ;;  %1007 = vmatmul.msk.f32.gmra.mxu1 %vm350_vm1, %v297_v34 }
  0x6a   : > { %v324_v53 = vpop.permute.xlu2 %323 }
  0x74   : > { %v319_v10 = vpop.permute.xlu2 %318 }
  0x80   : > { %v344_v48 = vpop.permute.xlu0 %343  ;;  %v334_v49 = vpop.permute.xlu1 %333 }
  0x88   : > { %v339_v52 = vpop.permute.xlu0 %338  ;;  %v329_v54 = vpop.permute.xlu1 %328 }
  0x90   : > { %v314_v9 = vpop.permute.xlu0 %313  ;;  %v309_v16 = vpop.permute.xlu1 %308 }
  0x96   : > { %v397_v36 = vpop.f32.mrf.mxu0  ;;  %v1283_v37 = vpop.f32.mrf.mxu1 }
  0x97   : > { %v398_v26 = vadd.f32 %v397_v36, %v309_v16  ;;  %v439_v29 = vadd.f32 %v1283_v37, %v309_v16 }
  0x98   : > { %v594_v16 = vpop.permute.xlu1 %593 }
  0x9e   : > { %v400_v38 = vpop.f32.mrf.mxu0  ;;  %v441_v39 = vpop.f32.mrf.mxu1 }
  0x9f   : > { %v401_v20 = vadd.f32 %v400_v38, %v314_v9  ;;  %v442_v23 = vadd.f32 %v441_v39, %v314_v9  ;;  %v462_v38 = vmul.f32 0.2, %v398_v26  ;;  %v463_v39 = vmul.f32 0.2, %v439_v29 }
  0xa1   : > { %v464_v32 = vmul.f32 0.2, %v401_v20  ;;  %v465_v34 = vmul.f32 0.2, %v442_v23 }
  0xa6   : > { %v403_v40 = vpop.f32.mrf.mxu0  ;;  %v444_v41 = vpop.f32.mrf.mxu1 }
  0xa7   : > { %v404_v13 = vadd.f32 %v403_v40, %v319_v10  ;;  %v445_v17 = vadd.f32 %v444_v41, %v319_v10  ;;  %v480_v40 = vmax.f32 %v401_v20, %v464_v32  ;;  %v481_v41 = vmax.f32 %v442_v23, %v465_v34 }
  0xa9   : > { %v466_v27 = vmul.f32 0.2, %v404_v13  ;;  %v467_v30 = vmul.f32 0.2, %v445_v17 }
  0xab   : > { %v482_v36 = vmax.f32 %v404_v13, %v466_v27  ;;  %v483_v37 = vmax.f32 %v445_v17, %v467_v30 }
  0xae   : > { %v406_v42 = vpop.f32.mrf.mxu0  ;;  %v447_v43 = vpop.f32.mrf.mxu1 }
  0xaf   : > { %v407_v5 = vadd.f32 %v406_v42, %v324_v53  ;;  %v448_v11 = vadd.f32 %v447_v43, %v324_v53  ;;  %v478_v42 = vmax.f32 %v398_v26, %v462_v38  ;;  %v479_v43 = vmax.f32 %v439_v29, %v463_v39  ;;  %v503_v53 = vld [vmem:[%s1433_s3 + $0x48] sm:$0xff] }
  0xb1   : > { %v468_v21 = vmul.f32 0.2, %v407_v5  ;;  %v469_v24 = vmul.f32 0.2, %v448_v11 }
  0xb3   : > { %v484_v33 = vmax.f32 %v407_v5, %v468_v21  ;;  %v485_v35 = vmax.f32 %v448_v11, %v469_v24 }
  0xb6   : > { %v409_v44 = vpop.f32.mrf.mxu0  ;;  %v450_v45 = vpop.f32.mrf.mxu1 }
  0xb7   : > { %v410_v63 = vadd.f32 %v409_v44, %v329_v54  ;;  %v451_v3 = vadd.f32 %v450_v45, %v329_v54  ;;  %v494_v44 = vld [vmem:[%s1433_s3] sm:$0xff]  ;;  %v504_v54 = vld [vmem:[%s1433_s3 + $0x50] sm:$0xff] }
  0xb8   : > { %v498_v45 = vld [vmem:[%s1433_s3 + $0x20] sm:$0xff] }
  0xb9   : > { %v470_v14 = vmul.f32 0.2, %v410_v63  ;;  %v471_v18 = vmul.f32 0.2, %v451_v3 }
  0xbb   : > { %v486_v28 = vmax.f32 %v410_v63, %v470_v14  ;;  %v487_v31 = vmax.f32 %v451_v3, %v471_v18 }
  0xbe   : > { %v412_v46 = vpop.f32.mrf.mxu0  ;;  %v453_v47 = vpop.f32.mrf.mxu1 }
  0xbf   : > { %v413_v59 = vadd.f32 %v412_v46, %v334_v49  ;;  %v454_v62 = vadd.f32 %v453_v47, %v334_v49  ;;  %v495_v46 = vld [vmem:[%s1433_s3 + $0x8] sm:$0xff]  ;;  %v500_v49 = vld [vmem:[%s1433_s3 + $0x30] sm:$0xff] }
  0xc0   : > { %v499_v47 = vld [vmem:[%s1433_s3 + $0x28] sm:$0xff] }
  0xc1   : > { %v472_v6 = vmul.f32 0.2, %v413_v59  ;;  %v473_v12 = vmul.f32 0.2, %v454_v62 }
  0xc3   : > { %v488_v22 = vmax.f32 %v413_v59, %v472_v6  ;;  %v489_v25 = vmax.f32 %v454_v62, %v473_v12  ;;  %v509_v59 = vld [vmem:[%s1433_s3 + $0x78] sm:$0xff]  ;;  %v604_v12 = vpop.permute.xlu2 %603 }
  0xc6   : > { %v415_v50 = vpop.f32.mrf.mxu0  ;;  %v456_v51 = vpop.f32.mrf.mxu1 }
  0xc7   : > { %v416_v55 = vadd.f32 %v415_v50, %v339_v52  ;;  %v457_v56 = vadd.f32 %v456_v51, %v339_v52  ;;  %v497_v50 = vld [vmem:[%s1433_s3 + $0x18] sm:$0xff]  ;;  %v502_v52 = vld [vmem:[%s1433_s3 + $0x40] sm:$0xff] }
  0xc8   : > { %v501_v51 = vld [vmem:[%s1433_s3 + $0x38] sm:$0xff] }
  0xc9   : > { %v474_v0 = vmul.f32 0.2, %v416_v55  ;;  %v475_v4 = vmul.f32 0.2, %v457_v56 }
  0xcb   : > { %v490_v15 = vmax.f32 %v416_v55, %v474_v0  ;;  %v491_v19 = vmax.f32 %v457_v56, %v475_v4  ;;  %v505_v55 = vld [vmem:[%s1433_s3 + $0x58] sm:$0xff]  ;;  %v506_v56 = vld [vmem:[%s1433_s3 + $0x60] sm:$0xff] }
  0xce   : > { %v418_v57 = vpop.f32.mrf.mxu0  ;;  %v459_v58 = vpop.f32.mrf.mxu1 }
  0xcf   : > { %v419_v60 = vadd.f32 %v418_v57, %v344_v48  ;;  %v460_v61 = vadd.f32 %v459_v58, %v344_v48  ;;  %v496_v48 = vld [vmem:[%s1433_s3 + $0x10] sm:$0xff]  ;;  %v507_v57 = vld [vmem:[%s1433_s3 + $0x68] sm:$0xff] }
  0xd0   : > { %v508_v58 = vld [vmem:[%s1433_s3 + $0x70] sm:$0xff] }
  0xd1   : > { %v476_v1 = vmul.f32 0.2, %v419_v60  ;;  %v477_v2 = vmul.f32 0.2, %v460_v61 }
  0xd3   : > { %v492_v7 = vmax.f32 %v419_v60, %v476_v1  ;;  %v493_v8 = vmax.f32 %v460_v61, %v477_v2 }
  0xd5   : > { %663 = vmatpush.msrb.mxu0 %v492_v7  ;;  %1043 = vmatpush.msra.mxu2 %v492_v7 }
  0xd6   : > { %728 = vmatpush.msrb.mxu1 %v493_v8  ;;  %1051 = vmatpush.msra.mxu3 %v493_v8 }
  0xd7   : > { %664 = vmatpush.msrb.mxu0 %v490_v15  ;;  %1044 = vmatpush.msra.mxu2 %v490_v15  ;;  %v599_v15 = vpop.permute.xlu0 %598 }
  0xd8   : > { %729 = vmatpush.msrb.mxu1 %v491_v19  ;;  %1052 = vmatpush.msra.mxu3 %v491_v19  ;;  %v589_v19 = vpop.permute.xlu2 %588 }
  0xd9   : > { %665 = vmatpush.msrb.mxu0 %v488_v22  ;;  %1045 = vmatpush.msra.mxu2 %v488_v22 }
  0xda   : > { %730 = vmatpush.msrb.mxu1 %v489_v25  ;;  %1053 = vmatpush.msra.mxu3 %v489_v25  ;;  %v579_v25 = vpop.permute.xlu1 %578 }
  0xdb   : > { %666 = vmatpush.msrb.mxu0 %v486_v28  ;;  %1046 = vmatpush.msra.mxu2 %v486_v28 }
  0xdc   : > { %731 = vmatpush.msrb.mxu1 %v487_v31  ;;  %1054 = vmatpush.msra.mxu3 %v487_v31 }
  0xdd   : > { %667 = vmatpush.msrb.mxu0 %v484_v33  ;;  %1047 = vmatpush.msra.mxu2 %v484_v33 }
  0xde   : > { %732 = vmatpush.msrb.mxu1 %v485_v35  ;;  %1055 = vmatpush.msra.mxu3 %v485_v35 }
  0xdf   : > { %668 = vmatpush.msrb.mxu0 %v482_v36  ;;  %1048 = vmatpush.msra.mxu2 %v482_v36  ;;  %v584_v22 = vpop.permute.xlu0 %583 }
  0xe0   : > { %733 = vmatpush.msrb.mxu1 %v483_v37  ;;  %1056 = vmatpush.msra.mxu3 %v483_v37  ;;  %v574_v26 = vpop.permute.xlu2 %573 }
  0xe1   : > { %669 = vmatpush.msrb.mxu0 %v480_v40  ;;  %1049 = vmatpush.msra.mxu2 %v480_v40 }
  0xe2   : > { %734 = vmatpush.msrb.mxu1 %v481_v41  ;;  %1057 = vmatpush.msra.mxu3 %v481_v41  ;;  %v564_v41 = vpop.permute.xlu1 %563 }
  0xe3   : > { %670 = vmatpush.msrb.mxu0 %v478_v42  ;;  %1050 = vmatpush.msra.mxu2 %v478_v42 }
  0xe4   : > { %735 = vmatpush.msrb.mxu1 %v479_v43  ;;  %1058 = vmatpush.msra.mxu3 %v479_v43 }
  0xe5   : > { %1008 = vmatmul.msk.f32.vlgmr.msrb.gmra.mxu0 %vm606_vm2, %v494_v44  ;;  %1012 = vmatmul.msk.f32.vlgmr.msra.gmra.mxu2 %vm606_vm2, %v498_v45 }
  0xe6   : > { %1024 = vmatmul.msk.f32.vlgmr.msrb.gmra.mxu1 %vm606_vm2, %v494_v44  ;;  %1028 = vmatmul.msk.f32.vlgmr.msra.gmra.mxu3 %vm606_vm2, %v498_v45 }
  0xe7   : > { %v569_v35 = vpop.permute.xlu0 %568 }
  0xed   : > { %1009 = vmatmul.msk.f32.gmra.mxu0 %vm606_vm2, %v495_v46  ;;  %1013 = vmatmul.msk.f32.gmra.mxu2 %vm606_vm2, %v499_v47 }
  0xee   : > { %1025 = vmatmul.msk.f32.gmra.mxu1 %vm606_vm2, %v495_v46  ;;  %1029 = vmatmul.msk.f32.gmra.mxu3 %vm606_vm2, %v499_v47 }
  0xf5   : > { %1010 = vmatmul.msk.f32.gmra.mxu0 %vm606_vm2, %v496_v48  ;;  %1014 = vmatmul.msk.f32.gmra.mxu2 %vm606_vm2, %v500_v49 }
  0xf6   : > { %1026 = vmatmul.msk.f32.gmra.mxu1 %vm606_vm2, %v496_v48  ;;  %1030 = vmatmul.msk.f32.gmra.mxu3 %vm606_vm2, %v500_v49  ;;  %v559_v48 = vpop.permute.xlu2 %558 }
  0xfd   : > { %1011 = vmatmul.msk.f32.gmra.mxu0 %vm606_vm2, %v497_v50  ;;  %1015 = vmatmul.msk.f32.gmra.mxu2 %vm606_vm2, %v501_v51 }
  0xfe   : > { %1027 = vmatmul.msk.f32.gmra.mxu1 %vm606_vm2, %v497_v50  ;;  %1031 = vmatmul.msk.f32.gmra.mxu3 %vm606_vm2, %v501_v51 }
 0x105   : > { %1016 = vmatmul.msk.f32.gmra.mxu2 %vm606_vm2, %v502_v52 }
 0x106   : > { %1032 = vmatmul.msk.f32.gmra.mxu3 %vm606_vm2, %v502_v52 }
 0x10d   : > { %1017 = vmatmul.msk.f32.gmra.mxu2 %vm606_vm2, %v503_v53 }
 0x10e   : > { %1033 = vmatmul.msk.f32.gmra.mxu3 %vm606_vm2, %v503_v53 }
 0x115   : > { %1018 = vmatmul.msk.f32.gmra.mxu2 %vm606_vm2, %v504_v54 }
 0x116   : > { %1034 = vmatmul.msk.f32.gmra.mxu3 %vm606_vm2, %v504_v54 }
 0x11d   : > { %1019 = vmatmul.msk.f32.gmra.mxu2 %vm606_vm2, %v505_v55 }
 0x11e   : > { %1035 = vmatmul.msk.f32.gmra.mxu3 %vm606_vm2, %v505_v55 }
 0x125   : > { %1020 = vmatmul.msk.f32.gmra.mxu2 %vm606_vm2, %v506_v56 }
 0x126   : > { %1036 = vmatmul.msk.f32.gmra.mxu3 %vm606_vm2, %v506_v56 }
 0x12d   : > { %1021 = vmatmul.msk.f32.gmra.mxu2 %vm606_vm2, %v507_v57 }
 0x12e   : > { %1037 = vmatmul.msk.f32.gmra.mxu3 %vm606_vm2, %v507_v57 }
 0x135   : > { %1022 = vmatmul.msk.f32.gmra.mxu2 %vm606_vm2, %v508_v58 }
 0x136   : > { %1038 = vmatmul.msk.f32.gmra.mxu3 %vm606_vm2, %v508_v58 }
 0x13d   : > { %1023 = vmatmul.msk.f32.gmra.mxu2 %vm606_vm2, %v509_v59 }
 0x13e   : > { %1039 = vmatmul.msk.f32.gmra.mxu3 %vm606_vm2, %v509_v59 }
 0x162   : > { %v1386_v20 = vpop.f32.mrf.mxu0 }
 0x163   : > { %v1388_v21 = vpop.f32.mrf.mxu1 }
 0x168   : > { %v1366_v60 = vpop.f32.mrf.mxu2 }
 0x169   : > { %v1368_v61 = vpop.f32.mrf.mxu3 }
 0x16a   : > { %v1390_v27 = vpop.f32.mrf.mxu0 }
 0x16b   : > { %v1392_v28 = vpop.f32.mrf.mxu1 }
 0x170   : > { %v1370_v62 = vpop.f32.mrf.mxu2 }
 0x171   : > { %v1372_v63 = vpop.f32.mrf.mxu3 }
 0x172   : > { %v1394_v55 = vpop.f32.mrf.mxu0 }
 0x173   : > { %v1396_v59 = vpop.f32.mrf.mxu1 }
 0x178   : > { %v1374_v0 = vpop.f32.mrf.mxu2 }
 0x179   : > { %v1376_v1 = vpop.f32.mrf.mxu3 }
 0x180   : > { %v1378_v2 = vpop.f32.mrf.mxu2 }
 0x181   : > { %v1380_v3 = vpop.f32.mrf.mxu3 }
 0x188   : > { %v1382_v4 = vpop.f32.mrf.mxu2 }
 0x189   : > { %v1384_v5 = vpop.f32.mrf.mxu3 }
 0x190   : > { %v699_v6 = vpop.f32.mrf.mxu2 }
 0x191   : > { %v764_v7 = vpop.f32.mrf.mxu3 }
 0x198   : > { %v702_v8 = vpop.f32.mrf.mxu2 }
 0x199   : > { %v767_v9 = vpop.f32.mrf.mxu3  ;;  %v703_v52 = vadd.f32 %v702_v8, %v579_v25  ;;  %v697_v8 = vadd.f32 %v1382_v4, %v569_v35  ;;  %v691_v4 = vadd.f32 %v1374_v0, %v559_v48 }
 0x19a   : > { %v768_v56 = vadd.f32 %v767_v9, %v579_v25  ;;  %v762_v9 = vadd.f32 %v1384_v5, %v569_v35  ;;  %v759_v25 = vadd.f32 %v1380_v3, %v564_v41  ;;  %v544_v5 = vpop.permute.xlu2 %543 }
 0x1a0   : > { %v705_v10 = vpop.f32.mrf.mxu2 }
 0x1a1   : > { %v770_v11 = vpop.f32.mrf.mxu3  ;;  %v706_v45 = vadd.f32 %v705_v10, %v584_v22 }
 0x1a2   : > { %v771_v49 = vadd.f32 %v770_v11, %v584_v22 }
 0x1a3   : > { %v807_v10 = vmul.f32 0.2, %v706_v45 }
 0x1a4   : > { %v808_v11 = vmul.f32 0.2, %v771_v49 }
 0x1a8   : > { %v708_v13 = vpop.f32.mrf.mxu2 }
 0x1a9   : > { %v773_v14 = vpop.f32.mrf.mxu3  ;;  %v709_v39 = vadd.f32 %v708_v13, %v589_v19 }
 0x1aa   : > { %v774_v42 = vadd.f32 %v773_v14, %v589_v19  ;;  %v765_v14 = vadd.f32 %v764_v7, %v574_v26  ;;  %v806_v19 = vmul.f32 0.2, %v768_v56  ;;  %v549_v7 = vpop.permute.xlu1 %548 }
 0x1ab   : > { %v809_v53 = vmul.f32 0.2, %v709_v39  ;;  %v685_v0 = vadd.f32 %v1366_v60, %v549_v7 }
 0x1ac   : > { %v810_v57 = vmul.f32 0.2, %v774_v42 }
 0x1ae   : > { %v842_v22 = vmax.f32 %v774_v42, %v810_v57 }
 0x1b0   : > { %v711_v17 = vpop.f32.mrf.mxu2 }
 0x1b1   : > { %v776_v18 = vpop.f32.mrf.mxu3  ;;  %v712_v32 = vadd.f32 %v711_v17, %v594_v16  ;;  %v841_v17 = vmax.f32 %v709_v39, %v809_v53  ;;  %v800_v39 = vmul.f32 0.2, %v759_v25 }
 0x1b2   : > { %v777_v38 = vadd.f32 %v776_v18, %v594_v16  ;;  %v805_v16 = vmul.f32 0.2, %v703_v52  ;;  %v554_v18 = vpop.permute.xlu0 %553 }
 0x1b3   : > { %v811_v46 = vmul.f32 0.2, %v712_v32  ;;  %v753_v3 = vadd.f32 %v1372_v63, %v554_v18 }
 0x1b4   : > { %v812_v50 = vmul.f32 0.2, %v777_v38 }
 0x1b5   : > { %v843_v13 = vmax.f32 %v712_v32, %v811_v46  ;;  %v756_v32 = vadd.f32 %v1376_v1, %v559_v48  ;;  %v750_v1 = vadd.f32 %v1368_v61, %v549_v7  ;;  %v849_v7 = vld [vmem:[%s1435_s5] sm:$0x1] }
 0x1b7   : > { %v794_v53 = vmul.f32 0.2, %v750_v1 }
 0x1b8   : > { %v714_v23 = vpop.f32.mrf.mxu2 }
 0x1b9   : > { %v779_v24 = vpop.f32.mrf.mxu3  ;;  %v715_v29 = vadd.f32 %v714_v23, %v599_v15 }
 0x1ba   : > { %v780_v30 = vadd.f32 %v779_v24, %v599_v15  ;;  %v844_v15 = vmax.f32 %v777_v38, %v812_v50  ;;  %v839_v24 = vmax.f32 %v706_v45, %v807_v10  ;;  %v539_v63 = vpop.permute.xlu0 %538  ;;  %v793_v50 = vmul.f32 0.2, %v685_v0 }
 0x1bb   : > { %v813_v37 = vmul.f32 0.2, %v715_v29  ;;  %v679_v60 = vadd.f32 %v1394_v55, %v539_v63  ;;  %v744_v61 = vadd.f32 %v1396_v59, %v539_v63 }
 0x1bc   : > { %v814_v43 = vmul.f32 0.2, %v780_v30 }
 0x1bd   : > { %v845_v54 = vmax.f32 %v715_v29, %v813_v37  ;;  %v840_v29 = vmax.f32 %v771_v49, %v808_v11  ;;  %v832_v49 = vmax.f32 %v759_v25, %v800_v39  ;;  %v825_v11 = vmax.f32 %v685_v0, %v793_v50 }
 0x1be   : > { %v846_v58 = vmax.f32 %v780_v30, %v814_v43  ;;  %v801_v30 = vmul.f32 0.2, %v697_v8  ;;  %v798_v43 = vmul.f32 0.2, %v756_v32  ;;  %v896_v25 = vlaneseq }
 0x1c0   : > { %v717_v31 = vpop.f32.mrf.mxu2  ;;  %v833_v42 = vmax.f32 %v697_v8, %v801_v30  ;;  %v826_v8 = vmax.f32 %v750_v1, %v794_v53  ;;  %vm898_vm4 = vcmp.lt.s32.totalorder %v896_v25, 256 }
 0x1c1   : > { %v718_v33 = vadd.f32 %v717_v31, %v604_v12  ;;  %v782_v34 = vpop.f32.mrf.mxu3  ;;  %v837_v31 = vmax.f32 %v703_v52, %v805_v16  ;;  %v534_v52 = vpop.permute.xlu1 %533  ;;  %v790_v16 = vmul.f32 0.2, %v744_v61 }
 0x1c2   : > { %v783_v36 = vadd.f32 %v782_v34, %v604_v12  ;;  %v700_v12 = vadd.f32 %v699_v6, %v574_v26  ;;  %v694_v6 = vadd.f32 %v1378_v2, %v564_v41  ;;  %v804_v26 = vmul.f32 0.2, %v765_v14  ;;  %v746_v41 = vpop.f32.mrf.mxu1 }
 0x1c3   : > { %v815_v40 = vmul.f32 0.2, %v718_v33  ;;  %v838_v34 = vmax.f32 %v768_v56, %v806_v19  ;;  %v688_v2 = vadd.f32 %v1370_v62, %v554_v18  ;;  %v747_v48 = vadd.f32 %v746_v41, %v544_v5 }
 0x1c4   : > { %v816_v44 = vmul.f32 0.2, %v783_v36  ;;  %v803_v23 = vmul.f32 0.2, %v700_v12  ;;  %v799_v35 = vmul.f32 0.2, %v694_v6  ;;  %v836_v37 = vmax.f32 %v765_v14, %v804_v26 }
 0x1c5   : > { %v847_v47 = vmax.f32 %v718_v33, %v815_v40  ;;  %v802_v33 = vmul.f32 0.2, %v762_v9  ;;  %v797_v40 = vmul.f32 0.2, %v691_v4  ;;  %v795_v62 = vmul.f32 0.2, %v688_v2 }
 0x1c6   : > { %v848_v51 = vmax.f32 %v783_v36, %v816_v44  ;;  %v835_v38 = vmax.f32 %v700_v12, %v803_v23  ;;  %v681_v36 = vpop.f32.mrf.mxu0  ;;  %v831_v46 = vmax.f32 %v694_v6, %v799_v35  ;;  %v676_v56 = vadd.f32 %v1390_v27, %v534_v52  ;;  %v529_v12 = vpop.permute.xlu2 %528 }
 0x1c7   : > { %850 = vmatpush.msra.mxu0 %v847_v47  ;;  %v834_v44 = vmax.f32 %v762_v9, %v802_v33  ;;  %v682_v45 = vadd.f32 %v681_v36, %v544_v5  ;;  %v796_v47 = vmul.f32 0.2, %v753_v3  ;;  %v827_v57 = vmax.f32 %v688_v2, %v795_v62 }
 0x1c8   : > { %870 = vmatpush.msra.mxu1 %v848_v51  ;;  %v829_v51 = vmax.f32 %v691_v4, %v797_v40  ;;  %v741_v10 = vadd.f32 %v1392_v28, %v534_v52  ;;  %v792_v14 = vmul.f32 0.2, %v747_v48  ;;  %v673_v55 = vadd.f32 %v1386_v20, %v529_v12 }
 0x1c9   : > { %851 = vmatpush.msra.mxu0 %v845_v54  ;;  %v830_v54 = vmax.f32 %v756_v32, %v798_v43  ;;  %v738_v59 = vadd.f32 %v1388_v21, %v529_v12  ;;  %v787_v27 = vmul.f32 0.2, %v676_v56  ;;  %v822_v6 = vmax.f32 %v744_v61, %v790_v16 }
 0x1ca   : > { %871 = vmatpush.msra.mxu1 %v846_v58  ;;  %v791_v58 = vmul.f32 0.2, %v682_v45  ;;  %v788_v18 = vmul.f32 0.2, %v741_v10  ;;  %v824_v9 = vmax.f32 %v747_v48, %v792_v14  ;;  %v785_v28 = vmul.f32 0.2, %v673_v55 }
 0x1cb   : > { %852 = vmatpush.msra.mxu0 %v843_v13  ;;  %v828_v13 = vmax.f32 %v753_v3, %v796_v47  ;;  %v819_v20 = vmax.f32 %v676_v56, %v787_v27 }
 0x1cc   : > { %872 = vmatpush.msra.mxu1 %v844_v15  ;;  %v789_v15 = vmul.f32 0.2, %v679_v60  ;;  %v820_v23 = vmax.f32 %v741_v10, %v788_v18  ;;  %v817_v21 = vmax.f32 %v673_v55, %v785_v28 }
 0x1cd   : > { %853 = vmatpush.msra.mxu0 %v841_v17  ;;  %v823_v17 = vmax.f32 %v682_v45, %v791_v58 }
 0x1ce   : > { %873 = vmatpush.msra.mxu1 %v842_v22  ;;  %v821_v19 = vmax.f32 %v679_v60, %v789_v15  ;;  %v786_v22 = vmul.f32 0.2, %v738_v59 }
 0x1cf   : > { %854 = vmatpush.msra.mxu0 %v839_v24 }
 0x1d0   : > { %874 = vmatpush.msra.mxu1 %v840_v29  ;;  %v818_v24 = vmax.f32 %v738_v59, %v786_v22 }
 0x1d1   : > { %855 = vmatpush.msra.mxu0 %v837_v31 }
 0x1d2   : > { %875 = vmatpush.msra.mxu1 %v838_v34 }
 0x1d3   : > { %856 = vmatpush.msra.mxu0 %v835_v38 }
 0x1d4   : > { %876 = vmatpush.msra.mxu1 %v836_v37 }
 0x1d5   : > { %857 = vmatpush.msra.mxu0 %v833_v42 }
 0x1d6   : > { %877 = vmatpush.msra.mxu1 %v834_v44 }
 0x1d7   : > { %858 = vmatpush.msra.mxu0 %v831_v46 }
 0x1d8   : > { %878 = vmatpush.msra.mxu1 %v832_v49 }
 0x1d9   : > { %859 = vmatpush.msra.mxu0 %v829_v51 }
 0x1da   : > { %879 = vmatpush.msra.mxu1 %v830_v54 }
 0x1db   : > { %860 = vmatpush.msra.mxu0 %v827_v57 }
 0x1dc   : > { %880 = vmatpush.msra.mxu1 %v828_v13 }
 0x1dd   : > { %861 = vmatpush.msra.mxu0 %v825_v11 }
 0x1de   : > { %881 = vmatpush.msra.mxu1 %v826_v8 }
 0x1df   : > { %862 = vmatpush.msra.mxu0 %v823_v17 }
 0x1e0   : > { %882 = vmatpush.msra.mxu1 %v824_v9 }
 0x1e1   : > { %863 = vmatpush.msra.mxu0 %v821_v19 }
 0x1e2   : > { %883 = vmatpush.msra.mxu1 %v822_v6 }
 0x1e3   : > { %864 = vmatpush.msra.mxu0 %v819_v20 }
 0x1e4   : > { %884 = vmatpush.msra.mxu1 %v820_v23 }
 0x1e5   : > { %865 = vmatpush.msra.mxu0 %v817_v21 }
 0x1e6   : > { %885 = vmatpush.msra.mxu1 %v818_v24  ;;  %866 = vmatmul.f32.vlgmr.msra.gmra.mxu0 %v849_v7 }
 0x1e7   : > { %886 = vmatmul.f32.vlgmr.msra.gmra.mxu1 %v849_v7 }
 0x263   : > { %v867_v29 = vpop.f32.mrf.mxu0 }
 0x264   : > { %v887_v26 = vpop.f32.mrf.mxu1 }
 0x265   : > { %v892_v4 = vrot.slane %v887_v26, 7 }
 0x267   : > { %v894_v30 = vsel %vm893_vm3, %v867_v29, %v892_v4 }
 0x268   : > { %900 = vst.msk [vmem:[%s287_s30] sm:$0x3] %vm898_vm4, %v894_v30 }
 0x269 PF: > { %s16_s23 = sadd.s32 1, %s1109_s23   ;;  %s1437_s21 = smov %s1105_s22 }
 0x26a   : > { %p13_p5 = scmp.ge.s32.totalorder %s16_s23, 4   ;;  %s1438_s22 = smov %s1440_s24 }
 0x26c   :  { %15 = sbr.rel (!%p13_p5) target bundleno = 2 (0x2), region = 74 }

// kernel: pixel_discriminator.2
= control target key start
LH: loop header
LB: loop body
LE: loop exit
PB: predicated region body
PF: predicated region fallthrough
CT: control target
= control target key end

     0   :  { %s1197_s18 = smov 0   ;;  %s1199_s19 = smov 0   ;;  %s1552_s0 = inlined_call_operand.vmem [shape: f32[2,4,256], index: 0, kind: input, shape index: {}]   ;;  %s1553_s1 = inlined_call_operand.vmem [shape: f32[64,4], index: 1, kind: input, shape index: {}]   ;;  %s1554_s2 = inlined_call_operand.vmem [shape: f32[64,1], index: 2, kind: input, shape index: {}]   ;;  %s1555_s3 = inlined_call_operand.vmem [shape: f32[128,64], index: 3, kind: input, shape index: {}]   ;;  %s1556_s4 = inlined_call_operand.vmem [shape: f32[2,128,1], index: 4, kind: output, shape index: {0}]   ;;  %s1557_s5 = inlined_call_operand.vmem [shape: f32[2,128,1], index: 5, kind: output, shape index: {1}]  }
   0x1   :  { %s1201_s20 = smov 0  }
   0x2 LB: > { %s28_s21 = sadd.s32 1, %s1159_s19  ;;  %p1034_p0 = scmp.ge.s32.totalorder %s1163_s20, 1  ;;  %s1163_s20 = sphi %s1201_s20, %s16_s20   ;;  %s1159_s19 = sphi %s1199_s19, %s1559_s19   ;;  %s1155_s18 = sphi %s1197_s18, %s1558_s18  }
   0x3   : > { %p30_p1 = scmp.ge.s32.totalorder %s28_s21, 2  ;;  %p209_p2 = scmp.lt.s32.totalorder %s1163_s20, 3 }
   0x5   : > { %s1561_s21 = smov (%p30_p1, %s28_s21), 0  ;;  %p210_p3 = pnand %p1034_p0, %p209_p2 }
   0x6   : > { %p247_p4 = scmp.lt.s32.totalorder (!%p210_p3), %s1155_s18, 1 }
   0x7   : > { %213 = sbr.rel (%p210_p3) target bundleno = 579 (0x243), region = 36 }
   0xc   : > { %v317_v0 = vld [vmem:[%s1554_s2 + $0x28] sm:$0xff]  ;;  %v1165_v1 = vmov 0   ;;  %v319_v2 = vld [vmem:[%s1554_s2 + $0x38] sm:$0xff]  ;;  %s1563_s18 = smov (!%p247_p4, %s1155_s18), 1  ;;  %v316_v4 = vld [vmem:[%s1554_s2 + $0x20] sm:$0xff]  ;;  %vm389_vm0 = vcmask 1043456  }
   0xd   : > { %1139 = vset.pattern.permute.xlu1 %v1165_v1  ;;  %1138 = vset.pattern.permute.xlu0 %v1165_v1  ;;  %s1093_s26 = sshll.u32 %s1563_s18, 3  ;;  %v318_v5 = vld [vmem:[%s1554_s2 + $0x30] sm:$0xff]  ;;  %v304_v6 = vld [vmem:[%s1553_s1] sm:$0xff]  ;;  %vm364_vm1 = vcmask 31744   ;;  %v313_v10 = vld [vmem:[%s1554_s2 + $0x8] sm:$0xff]  ;;  %vm524_vm2 = vcmask 523264  }
   0xe   : > { %347 = vperm.xlu1 %1139, %v317_v0   ;;  %357 = vperm.xlu0 %1138, %v319_v2   ;;  %s254_s29 = scalar_lea.vmem %s1552_s0, %s1093_s26  ;;  %v312_v9 = vld [vmem:[%s1554_s2] sm:$0xff]  ;;  %v305_v11 = vld [vmem:[%s1553_s1 + $0x8] sm:$0xff]  ;;  %v315_v12 = vld [vmem:[%s1554_s2 + $0x18] sm:$0xff]  ;;  %s1094_s27 = sshll.u32 %s1563_s18, 7  ;;  %vm270_vm3 = vcmask 7168  }
   0xf   : > { %1140 = vset.pattern.permute.xlu2 %v1165_v1  ;;  %v303_v3 = vld [vmem:[%s254_s29] sm:$0xff]  ;;  %v306_v13 = vld [vmem:[%s1553_s1 + $0x10] sm:$0xff]  ;;  %v307_v15 = vld [vmem:[%s1553_s1 + $0x18] sm:$0xff]  ;;  %s1374_s30 = scalar_lea.vmem %s1556_s4, %s1094_s27  ;;  %s1407_s8 = scalar_lea.vmem %s1557_s5, %s1094_s27 }
  0x10   : > { %361 = vst [vmem:[#allocation1] ss:$2 sm:$0xff] %v303_v3  ;;  %337 = vperm.xlu2 %1140, %v315_v12   ;;  %v314_v14 = vld [vmem:[%s1554_s2 + $0x10] sm:$0xff]  ;;  %v308_v16 = vld [vmem:[%s1553_s1 + $0x20] sm:$0xff]  ;;  %v309_v17 = vld [vmem:[%s1553_s1 + $0x28] sm:$0xff] }
  0x11   : > { %v310_v18 = vld [vmem:[%s1553_s1 + $0x30] sm:$0xff]  ;;  %v311_v19 = vld [vmem:[%s1553_s1 + $0x38] sm:$0xff] }
  0x16   : > { %342 = vperm.xlu1 %1139, %v316_v4   ;;  %352 = vperm.xlu0 %1138, %v318_v5  }
  0x17   : > { %v362_v7 = vld.sshfl [vmem:[#allocation1] sm:$0xff pattern:$0x75316420]  ;;  %v363_v8 = vld.sshfl [vmem:[#allocation1 + $0x8] sm:$0xff pattern:$0x75316420] }
  0x18   : > { %1041 = vmatpush.msk.msra.mxu0 %vm389_vm0, %v362_v7  ;;  %1050 = vmatpush.msk.msra.mxu1 %vm389_vm0, %v363_v8 }
  0x19   : > { %1042 = vmatmul.msk.f32.vlgmr.msra.gmra.mxu0 %vm364_vm1, %v304_v6  ;;  %1051 = vmatmul.msk.f32.vlgmr.msra.gmra.mxu1 %vm364_vm1, %v304_v6 }
  0x1a   : > { %332 = vperm.xlu2 %1140, %v314_v14  }
  0x1e   : > { %322 = vperm.xlu1 %1139, %v312_v9   ;;  %327 = vperm.xlu0 %1138, %v313_v10  }
  0x21   : > { %1043 = vmatmul.msk.f32.gmra.mxu0 %vm364_vm1, %v305_v11  ;;  %1052 = vmatmul.msk.f32.gmra.mxu1 %vm364_vm1, %v305_v11 }
  0x29   : > { %1044 = vmatmul.msk.f32.gmra.mxu0 %vm364_vm1, %v306_v13  ;;  %1053 = vmatmul.msk.f32.gmra.mxu1 %vm364_vm1, %v306_v13 }
  0x31   : > { %1045 = vmatmul.msk.f32.gmra.mxu0 %vm364_vm1, %v307_v15  ;;  %1054 = vmatmul.msk.f32.gmra.mxu1 %vm364_vm1, %v307_v15 }
  0x39   : > { %1046 = vmatmul.msk.f32.gmra.mxu0 %vm364_vm1, %v308_v16  ;;  %1055 = vmatmul.msk.f32.gmra.mxu1 %vm364_vm1, %v308_v16 }
  0x41   : > { %1047 = vmatmul.msk.f32.gmra.mxu0 %vm364_vm1, %v309_v17  ;;  %1056 = vmatmul.msk.f32.gmra.mxu1 %vm364_vm1, %v309_v17 }
  0x49   : > { %1048 = vmatmul.msk.f32.gmra.mxu0 %vm364_vm1, %v310_v18  ;;  %1057 = vmatmul.msk.f32.gmra.mxu1 %vm364_vm1, %v310_v18 }
  0x51   : > { %1049 = vmatmul.msk.f32.gmra.mxu0 %vm364_vm1, %v311_v19  ;;  %1058 = vmatmul.msk.f32.gmra.mxu1 %vm364_vm1, %v311_v19 }
  0x6a   : > { %v338_v36 = vpop.permute.xlu2 %337 }
  0x74   : > { %v333_v51 = vpop.permute.xlu2 %332 }
  0x80   : > { %v358_v32 = vpop.permute.xlu0 %357  ;;  %v348_v33 = vpop.permute.xlu1 %347 }
  0x88   : > { %v353_v37 = vpop.permute.xlu0 %352  ;;  %v343_v38 = vpop.permute.xlu1 %342 }
  0x90   : > { %v328_v58 = vpop.permute.xlu0 %327  ;;  %v323_v0 = vpop.permute.xlu1 %322 }
  0x96   : > { %v411_v20 = vpop.f32.mrf.mxu0  ;;  %v1285_v21 = vpop.f32.mrf.mxu1 }
  0x97   : > { %v412_v10 = vadd.f32 %v411_v20, %v323_v0  ;;  %v453_v13 = vadd.f32 %v1285_v21, %v323_v0 }
  0x9e   : > { %v414_v22 = vpop.f32.mrf.mxu0  ;;  %v455_v23 = vpop.f32.mrf.mxu1 }
  0x9f   : > { %v415_v4 = vadd.f32 %v414_v22, %v328_v58  ;;  %v456_v7 = vadd.f32 %v455_v23, %v328_v58  ;;  %v476_v22 = vmul.f32 0.2, %v412_v10  ;;  %v477_v23 = vmul.f32 0.2, %v453_v13 }
  0xa1   : > { %v478_v16 = vmul.f32 0.2, %v415_v4  ;;  %v479_v18 = vmul.f32 0.2, %v456_v7 }
  0xa6   : > { %v417_v24 = vpop.f32.mrf.mxu0  ;;  %v458_v25 = vpop.f32.mrf.mxu1 }
  0xa7   : > { %v418_v61 = vadd.f32 %v417_v24, %v333_v51  ;;  %v459_v1 = vadd.f32 %v458_v25, %v333_v51  ;;  %v494_v24 = vmax.f32 %v415_v4, %v478_v16  ;;  %v495_v25 = vmax.f32 %v456_v7, %v479_v18 }
  0xa9   : > { %v480_v11 = vmul.f32 0.2, %v418_v61  ;;  %v481_v14 = vmul.f32 0.2, %v459_v1 }
  0xab   : > { %v496_v20 = vmax.f32 %v418_v61, %v480_v11  ;;  %v497_v21 = vmax.f32 %v459_v1, %v481_v14 }
  0xae   : > { %v420_v26 = vpop.f32.mrf.mxu0  ;;  %v461_v27 = vpop.f32.mrf.mxu1 }
  0xaf   : > { %v421_v54 = vadd.f32 %v420_v26, %v338_v36  ;;  %v462_v59 = vadd.f32 %v461_v27, %v338_v36  ;;  %v492_v26 = vmax.f32 %v412_v10, %v476_v22  ;;  %v493_v27 = vmax.f32 %v453_v13, %v477_v23  ;;  %v516_v36 = vld [vmem:[%s1555_s3 + $0x40] sm:$0xff] }
  0xb1   : > { %v482_v5 = vmul.f32 0.2, %v421_v54  ;;  %v483_v8 = vmul.f32 0.2, %v462_v59 }
  0xb3   : > { %v498_v17 = vmax.f32 %v421_v54, %v482_v5  ;;  %v499_v19 = vmax.f32 %v462_v59, %v483_v8 }
  0xb6   : > { %v423_v28 = vpop.f32.mrf.mxu0  ;;  %v464_v29 = vpop.f32.mrf.mxu1 }
  0xb7   : > { %v424_v47 = vadd.f32 %v423_v28, %v343_v38  ;;  %v465_v52 = vadd.f32 %v464_v29, %v343_v38  ;;  %v508_v28 = vld [vmem:[%s1555_s3] sm:$0xff]  ;;  %v518_v38 = vld [vmem:[%s1555_s3 + $0x50] sm:$0xff] }
  0xb8   : > { %v512_v29 = vld [vmem:[%s1555_s3 + $0x20] sm:$0xff] }
  0xb9   : > { %v484_v62 = vmul.f32 0.2, %v424_v47  ;;  %v485_v2 = vmul.f32 0.2, %v465_v52 }
  0xbb   : > { %v500_v12 = vmax.f32 %v424_v47, %v484_v62  ;;  %v501_v15 = vmax.f32 %v465_v52, %v485_v2 }
  0xbe   : > { %v426_v30 = vpop.f32.mrf.mxu0  ;;  %v467_v31 = vpop.f32.mrf.mxu1 }
  0xbf   : > { %v427_v43 = vadd.f32 %v426_v30, %v348_v33  ;;  %v468_v46 = vadd.f32 %v467_v31, %v348_v33  ;;  %v509_v30 = vld [vmem:[%s1555_s3 + $0x8] sm:$0xff]  ;;  %v514_v33 = vld [vmem:[%s1555_s3 + $0x30] sm:$0xff] }
  0xc0   : > { %v513_v31 = vld [vmem:[%s1555_s3 + $0x28] sm:$0xff] }
  0xc1   : > { %v486_v55 = vmul.f32 0.2, %v427_v43  ;;  %v487_v60 = vmul.f32 0.2, %v468_v46 }
  0xc3   : > { %v502_v6 = vmax.f32 %v427_v43, %v486_v55  ;;  %v503_v9 = vmax.f32 %v468_v46, %v487_v60  ;;  %v523_v43 = vld [vmem:[%s1555_s3 + $0x78] sm:$0xff] }
  0xc6   : > { %v429_v34 = vpop.f32.mrf.mxu0  ;;  %v470_v35 = vpop.f32.mrf.mxu1 }
  0xc7   : > { %v430_v39 = vadd.f32 %v429_v34, %v353_v37  ;;  %v471_v40 = vadd.f32 %v470_v35, %v353_v37  ;;  %v511_v34 = vld [vmem:[%s1555_s3 + $0x18] sm:$0xff]  ;;  %v517_v37 = vld [vmem:[%s1555_s3 + $0x48] sm:$0xff] }
  0xc8   : > { %v515_v35 = vld [vmem:[%s1555_s3 + $0x38] sm:$0xff] }
  0xc9   : > { %v488_v48 = vmul.f32 0.2, %v430_v39  ;;  %v489_v53 = vmul.f32 0.2, %v471_v40 }
  0xcb   : > { %v504_v63 = vmax.f32 %v430_v39, %v488_v48  ;;  %v505_v3 = vmax.f32 %v471_v40, %v489_v53  ;;  %v519_v39 = vld [vmem:[%s1555_s3 + $0x58] sm:$0xff]  ;;  %v520_v40 = vld [vmem:[%s1555_s3 + $0x60] sm:$0xff] }
  0xce   : > { %v432_v41 = vpop.f32.mrf.mxu0  ;;  %v473_v42 = vpop.f32.mrf.mxu1 }
  0xcf   : > { %v433_v44 = vadd.f32 %v432_v41, %v358_v32  ;;  %v474_v45 = vadd.f32 %v473_v42, %v358_v32  ;;  %v510_v32 = vld [vmem:[%s1555_s3 + $0x10] sm:$0xff]  ;;  %v521_v41 = vld [vmem:[%s1555_s3 + $0x68] sm:$0xff] }
  0xd0   : > { %v522_v42 = vld [vmem:[%s1555_s3 + $0x70] sm:$0xff] }
  0xd1   : > { %v490_v49 = vmul.f32 0.2, %v433_v44  ;;  %v491_v50 = vmul.f32 0.2, %v474_v45 }
  0xd3   : > { %v506_v56 = vmax.f32 %v433_v44, %v490_v49  ;;  %v507_v57 = vmax.f32 %v474_v45, %v491_v50 }
  0xd5   : > { %581 = vmatpush.msrb.mxu0 %v506_v56  ;;  %1096 = vmatpush.msra.mxu2 %v506_v56 }
  0xd6   : > { %646 = vmatpush.msrb.mxu1 %v507_v57  ;;  %1104 = vmatpush.msra.mxu3 %v507_v57 }
  0xd7   : > { %582 = vmatpush.msrb.mxu0 %v504_v63  ;;  %1097 = vmatpush.msra.mxu2 %v504_v63 }
  0xd8   : > { %647 = vmatpush.msrb.mxu1 %v505_v3  ;;  %1105 = vmatpush.msra.mxu3 %v505_v3 }
  0xd9   : > { %583 = vmatpush.msrb.mxu0 %v502_v6  ;;  %1098 = vmatpush.msra.mxu2 %v502_v6 }
  0xda   : > { %648 = vmatpush.msrb.mxu1 %v503_v9  ;;  %1106 = vmatpush.msra.mxu3 %v503_v9 }
  0xdb   : > { %584 = vmatpush.msrb.mxu0 %v500_v12  ;;  %1099 = vmatpush.msra.mxu2 %v500_v12 }
  0xdc   : > { %649 = vmatpush.msrb.mxu1 %v501_v15  ;;  %1107 = vmatpush.msra.mxu3 %v501_v15 }
  0xdd   : > { %585 = vmatpush.msrb.mxu0 %v498_v17  ;;  %1100 = vmatpush.msra.mxu2 %v498_v17 }
  0xde   : > { %650 = vmatpush.msrb.mxu1 %v499_v19  ;;  %1108 = vmatpush.msra.mxu3 %v499_v19 }
  0xdf   : > { %586 = vmatpush.msrb.mxu0 %v496_v20  ;;  %1101 = vmatpush.msra.mxu2 %v496_v20 }
  0xe0   : > { %651 = vmatpush.msrb.mxu1 %v497_v21  ;;  %1109 = vmatpush.msra.mxu3 %v497_v21 }
  0xe1   : > { %587 = vmatpush.msrb.mxu0 %v494_v24  ;;  %1102 = vmatpush.msra.mxu2 %v494_v24 }
  0xe2   : > { %652 = vmatpush.msrb.mxu1 %v495_v25  ;;  %1110 = vmatpush.msra.mxu3 %v495_v25 }
  0xe3   : > { %588 = vmatpush.msrb.mxu0 %v492_v26  ;;  %1103 = vmatpush.msra.mxu2 %v492_v26 }
  0xe4   : > { %653 = vmatpush.msrb.mxu1 %v493_v27  ;;  %1111 = vmatpush.msra.mxu3 %v493_v27 }
  0xe5   : > { %1059 = vmatmul.msk.f32.vlgmr.msrb.gmra.mxu0 %vm524_vm2, %v508_v28  ;;  %1075 = vmatmul.msk.f32.vlgmr.msrb.gmra.mxu1 %vm524_vm2, %v508_v28 }
  0xe6   : > { %1063 = vmatmul.msk.f32.vlgmr.msra.gmra.mxu2 %vm524_vm2, %v512_v29  ;;  %1079 = vmatmul.msk.f32.vlgmr.msra.gmra.mxu3 %vm524_vm2, %v512_v29 }
  0xed   : > { %1060 = vmatmul.msk.f32.gmra.mxu0 %vm524_vm2, %v509_v30  ;;  %1076 = vmatmul.msk.f32.gmra.mxu1 %vm524_vm2, %v509_v30 }
  0xee   : > { %1064 = vmatmul.msk.f32.gmra.mxu2 %vm524_vm2, %v513_v31  ;;  %1080 = vmatmul.msk.f32.gmra.mxu3 %vm524_vm2, %v513_v31 }
  0xf5   : > { %1061 = vmatmul.msk.f32.gmra.mxu0 %vm524_vm2, %v510_v32  ;;  %1077 = vmatmul.msk.f32.gmra.mxu1 %vm524_vm2, %v510_v32 }
  0xf6   : > { %1065 = vmatmul.msk.f32.gmra.mxu2 %vm524_vm2, %v514_v33  ;;  %1081 = vmatmul.msk.f32.gmra.mxu3 %vm524_vm2, %v514_v33 }
  0xfd   : > { %1062 = vmatmul.msk.f32.gmra.mxu0 %vm524_vm2, %v511_v34  ;;  %1078 = vmatmul.msk.f32.gmra.mxu1 %vm524_vm2, %v511_v34 }
  0xfe   : > { %1066 = vmatmul.msk.f32.gmra.mxu2 %vm524_vm2, %v515_v35  ;;  %1082 = vmatmul.msk.f32.gmra.mxu3 %vm524_vm2, %v515_v35 }
 0x106   : > { %1067 = vmatmul.msk.f32.gmra.mxu2 %vm524_vm2, %v516_v36  ;;  %1083 = vmatmul.msk.f32.gmra.mxu3 %vm524_vm2, %v516_v36 }
 0x10e   : > { %1068 = vmatmul.msk.f32.gmra.mxu2 %vm524_vm2, %v517_v37  ;;  %1084 = vmatmul.msk.f32.gmra.mxu3 %vm524_vm2, %v517_v37 }
 0x116   : > { %1069 = vmatmul.msk.f32.gmra.mxu2 %vm524_vm2, %v518_v38  ;;  %1085 = vmatmul.msk.f32.gmra.mxu3 %vm524_vm2, %v518_v38 }
 0x11e   : > { %1070 = vmatmul.msk.f32.gmra.mxu2 %vm524_vm2, %v519_v39  ;;  %1086 = vmatmul.msk.f32.gmra.mxu3 %vm524_vm2, %v519_v39 }
 0x126   : > { %1071 = vmatmul.msk.f32.gmra.mxu2 %vm524_vm2, %v520_v40  ;;  %1087 = vmatmul.msk.f32.gmra.mxu3 %vm524_vm2, %v520_v40 }
 0x12e   : > { %1072 = vmatmul.msk.f32.gmra.mxu2 %vm524_vm2, %v521_v41  ;;  %1088 = vmatmul.msk.f32.gmra.mxu3 %vm524_vm2, %v521_v41 }
 0x136   : > { %1073 = vmatmul.msk.f32.gmra.mxu2 %vm524_vm2, %v522_v42  ;;  %1089 = vmatmul.msk.f32.gmra.mxu3 %vm524_vm2, %v522_v42 }
 0x13e   : > { %1074 = vmatmul.msk.f32.gmra.mxu2 %vm524_vm2, %v523_v43  ;;  %1090 = vmatmul.msk.f32.gmra.mxu3 %vm524_vm2, %v523_v43 }
 0x162   : > { %v590_v44 = vpop.f32.mrf.mxu0  ;;  %v655_v45 = vpop.f32.mrf.mxu1 }
 0x163   : > { %v719_v46 = vadd.f32 %v655_v45, %v590_v44  ;;  %v816_v47 = vmul.f32 %v590_v44, %v590_v44  ;;  %v817_v48 = vmul.f32 %v655_v45, %v655_v45 }
 0x165   : > { %720 = vadd.xlane.f32.xlu2 %v719_v46  ;;  %v848_v51 = vadd.f32 %v817_v48, %v816_v47 }
 0x169   : > { %v602_v49 = vpop.f32.mrf.mxu2  ;;  %v667_v50 = vpop.f32.mrf.mxu3 }
 0x16a   : > { %v593_v52 = vpop.f32.mrf.mxu0  ;;  %v658_v53 = vpop.f32.mrf.mxu1  ;;  %v824_v55 = vmul.f32 %v602_v49, %v602_v49  ;;  %v825_v56 = vmul.f32 %v667_v50, %v667_v50  ;;  %v731_v61 = vadd.f32 %v667_v50, %v602_v49 }
 0x16b   : > { %v722_v54 = vadd.f32 %v658_v53, %v593_v52  ;;  %v818_v0 = vmul.f32 %v593_v52, %v593_v52  ;;  %v819_v1 = vmul.f32 %v658_v53, %v658_v53 }
 0x16c   : > { %v860_v62 = vadd.f32 %v825_v56, %v824_v55 }
 0x16d   : > { %849 = vadd.xlane.f32.xlu2 %v848_v51  ;;  %723 = vadd.xlane.f32.xlu0 %v722_v54  ;;  %v851_v6 = vadd.f32 %v819_v1, %v818_v0 }
 0x171   : > { %v605_v57 = vpop.f32.mrf.mxu2  ;;  %v670_v58 = vpop.f32.mrf.mxu3 }
 0x172   : > { %v596_v59 = vpop.f32.mrf.mxu0  ;;  %v661_v60 = vpop.f32.mrf.mxu1  ;;  %v826_v2 = vmul.f32 %v605_v57, %v605_v57  ;;  %v827_v3 = vmul.f32 %v670_v58, %v670_v58  ;;  %v734_v18 = vadd.f32 %v670_v58, %v605_v57  ;;  %v1166_v58 = vmov 0.0  }
 0x173   : > { %v725_v63 = vadd.f32 %v661_v60, %v596_v59  ;;  %v820_v11 = vmul.f32 %v596_v59, %v596_v59  ;;  %v821_v12 = vmul.f32 %v661_v60, %v661_v60  ;;  %271 = vst.msk [vmem:[%s1374_s30] sm:$0xff] %vm270_vm3, %v1166_v58 }
 0x174   : > { %v863_v10 = vadd.f32 %v827_v3, %v826_v2  ;;  %272 = vst.msk [vmem:[%s1374_s30 + $0x8] sm:$0xff] %vm270_vm3, %v1166_v58 }
 0x175   : > { %732 = vadd.xlane.f32.xlu2 %v731_v61  ;;  %861 = vadd.xlane.f32.xlu0 %v860_v62  ;;  %v854_v17 = vadd.f32 %v821_v12, %v820_v11  ;;  %273 = vst.msk [vmem:[%s1374_s30 + $0x10] sm:$0xff] %vm270_vm3, %v1166_v58 }
 0x176   : > { %726 = vadd.xlane.f32.xlu1 %v725_v63  ;;  %274 = vst.msk [vmem:[%s1374_s30 + $0x18] sm:$0xff] %vm270_vm3, %v1166_v58 }
 0x177   : > { %275 = vst.msk [vmem:[%s1374_s30 + $0x20] sm:$0xff] %vm270_vm3, %v1166_v58 }
 0x178   : > { %276 = vst.msk [vmem:[%s1374_s30 + $0x28] sm:$0xff] %vm270_vm3, %v1166_v58 }
 0x179   : > { %v608_v4 = vpop.f32.mrf.mxu2  ;;  %v673_v5 = vpop.f32.mrf.mxu3  ;;  %277 = vst.msk [vmem:[%s1374_s30 + $0x30] sm:$0xff] %vm270_vm3, %v1166_v58 }
 0x17a   : > { %v599_v7 = vpop.f32.mrf.mxu0  ;;  %v664_v8 = vpop.f32.mrf.mxu1  ;;  %v828_v13 = vmul.f32 %v608_v4, %v608_v4  ;;  %v829_v14 = vmul.f32 %v673_v5, %v673_v5  ;;  %v737_v28 = vadd.f32 %v673_v5, %v608_v4  ;;  %278 = vst.msk [vmem:[%s1374_s30 + $0x38] sm:$0xff] %vm270_vm3, %v1166_v58 }
 0x17b   : > { %v728_v9 = vadd.f32 %v664_v8, %v599_v7  ;;  %v822_v22 = vmul.f32 %v599_v7, %v599_v7  ;;  %v823_v20 = vmul.f32 %v664_v8, %v664_v8  ;;  %279 = vst.msk [vmem:[%s1374_s30 + $0x40] sm:$0xff] %vm270_vm3, %v1166_v58 }
 0x17c   : > { %v866_v19 = vadd.f32 %v829_v14, %v828_v13  ;;  %280 = vst.msk [vmem:[%s1374_s30 + $0x48] sm:$0xff] %vm270_vm3, %v1166_v58  ;;  %v703_v13 = vld [vmem:[%s1374_s30] sm:$0xff] }
 0x17d   : > { %852 = vadd.xlane.f32.xlu0 %v851_v6  ;;  %729 = vadd.xlane.f32.xlu2 %v728_v9  ;;  %v857_v26 = vadd.f32 %v823_v20, %v822_v22  ;;  %281 = vst.msk [vmem:[%s1374_s30 + $0x50] sm:$0xff] %vm270_vm3, %v1166_v58 }
 0x17e   : > { %864 = vadd.xlane.f32.xlu1 %v863_v10  ;;  %282 = vst.msk [vmem:[%s1374_s30 + $0x58] sm:$0xff] %vm270_vm3, %v1166_v58 }
 0x17f   : > { %283 = vst.msk [vmem:[%s1374_s30 + $0x60] sm:$0xff] %vm270_vm3, %v1166_v58 }
 0x180   : > { %284 = vst.msk [vmem:[%s1374_s30 + $0x68] sm:$0xff] %vm270_vm3, %v1166_v58 }
 0x181   : > { %v611_v15 = vpop.f32.mrf.mxu2  ;;  %v676_v16 = vpop.f32.mrf.mxu3  ;;  %285 = vst.msk [vmem:[%s1374_s30 + $0x70] sm:$0xff] %vm270_vm3, %v1166_v58 }
 0x182   : > { %v830_v23 = vmul.f32 %v611_v15, %v611_v15  ;;  %v831_v21 = vmul.f32 %v676_v16, %v676_v16  ;;  %v740_v33 = vadd.f32 %v676_v16, %v611_v15  ;;  %286 = vst.msk [vmem:[%s1374_s30 + $0x78] sm:$0xff] %vm270_vm3, %v1166_v58 }
 0x183   : > { %287 = vst.msk [vmem:[%s1407_s8] sm:$0xff] %vm270_vm3, %v1166_v58 }
 0x184   : > { %v869_v27 = vadd.f32 %v831_v21, %v830_v23  ;;  %288 = vst.msk [vmem:[%s1407_s8 + $0x8] sm:$0xff] %vm270_vm3, %v1166_v58  ;;  %v707_v23 = vld [vmem:[%s1374_s30 + $0x20] sm:$0xff] }
 0x185   : > { %735 = vadd.xlane.f32.xlu0 %v734_v18  ;;  %867 = vadd.xlane.f32.xlu2 %v866_v19  ;;  %289 = vst.msk [vmem:[%s1407_s8 + $0x10] sm:$0xff] %vm270_vm3, %v1166_v58 }
 0x186   : > { %855 = vadd.xlane.f32.xlu1 %v854_v17  ;;  %290 = vst.msk [vmem:[%s1407_s8 + $0x18] sm:$0xff] %vm270_vm3, %v1166_v58  ;;  %v704_v17 = vld [vmem:[%s1374_s30 + $0x8] sm:$0xff] }
 0x187   : > { %291 = vst.msk [vmem:[%s1407_s8 + $0x20] sm:$0xff] %vm270_vm3, %v1166_v58 }
 0x188   : > { %292 = vst.msk [vmem:[%s1407_s8 + $0x28] sm:$0xff] %vm270_vm3, %v1166_v58 }
 0x189   : > { %v614_v24 = vpop.f32.mrf.mxu2  ;;  %v679_v25 = vpop.f32.mrf.mxu3  ;;  %293 = vst.msk [vmem:[%s1407_s8 + $0x30] sm:$0xff] %vm270_vm3, %v1166_v58 }
 0x18a   : > { %v832_v29 = vmul.f32 %v614_v24, %v614_v24  ;;  %v833_v30 = vmul.f32 %v679_v25, %v679_v25  ;;  %v743_v34 = vadd.f32 %v679_v25, %v614_v24  ;;  %294 = vst.msk [vmem:[%s1407_s8 + $0x38] sm:$0xff] %vm270_vm3, %v1166_v58  ;;  %v800_v16 = vld [vmem:[%s1407_s8] sm:$0xff]  ;;  %v705_v24 = vld [vmem:[%s1374_s30 + $0x10] sm:$0xff] }
 0x18b   : > { %295 = vst.msk [vmem:[%s1407_s8 + $0x40] sm:$0xff] %vm270_vm3, %v1166_v58 }
 0x18c   : > { %v872_v35 = vadd.f32 %v833_v30, %v832_v29  ;;  %296 = vst.msk [vmem:[%s1407_s8 + $0x48] sm:$0xff] %vm270_vm3, %v1166_v58 }
 0x18d   : > { %858 = vadd.xlane.f32.xlu2 %v857_v26  ;;  %870 = vadd.xlane.f32.xlu0 %v869_v27  ;;  %297 = vst.msk [vmem:[%s1407_s8 + $0x50] sm:$0xff] %vm270_vm3, %v1166_v58 }
 0x18e   : > { %738 = vadd.xlane.f32.xlu1 %v737_v28  ;;  %298 = vst.msk [vmem:[%s1407_s8 + $0x58] sm:$0xff] %vm270_vm3, %v1166_v58  ;;  %v804_v21 = vld [vmem:[%s1407_s8 + $0x20] sm:$0xff] }
 0x18f   : > { %299 = vst.msk [vmem:[%s1407_s8 + $0x60] sm:$0xff] %vm270_vm3, %v1166_v58 }
 0x190   : > { %300 = vst.msk [vmem:[%s1407_s8 + $0x68] sm:$0xff] %vm270_vm3, %v1166_v58 }
 0x191   : > { %v617_v31 = vpop.f32.mrf.mxu2  ;;  %v682_v32 = vpop.f32.mrf.mxu3  ;;  %301 = vst.msk [vmem:[%s1407_s8 + $0x70] sm:$0xff] %vm270_vm3, %v1166_v58 }
 0x192   : > { %v834_v36 = vmul.f32 %v617_v31, %v617_v31  ;;  %v835_v37 = vmul.f32 %v682_v32, %v682_v32  ;;  %v746_v43 = vadd.f32 %v682_v32, %v617_v31  ;;  %302 = vst.msk [vmem:[%s1407_s8 + $0x78] sm:$0xff] %vm270_vm3, %v1166_v58  ;;  %v801_v31 = vld [vmem:[%s1407_s8 + $0x8] sm:$0xff]  ;;  %v706_v32 = vld [vmem:[%s1374_s30 + $0x18] sm:$0xff] }
 0x193   : > { %v710_v58 = vld [vmem:[%s1374_s30 + $0x38] sm:$0xff] }
 0x194   : > { %v875_v42 = vadd.f32 %v835_v37, %v834_v36 }
 0x195   : > { %741 = vadd.xlane.f32.xlu2 %v740_v33  ;;  %744 = vadd.xlane.f32.xlu0 %v743_v34  ;;  %v805_v33 = vld [vmem:[%s1407_s8 + $0x28] sm:$0xff] }
 0x196   : > { %873 = vadd.xlane.f32.xlu1 %v872_v35 }
 0x199   : > { %v620_v38 = vpop.f32.mrf.mxu2  ;;  %v685_v39 = vpop.f32.mrf.mxu3 }
 0x19a   : > { %v836_v40 = vmul.f32 %v620_v38, %v620_v38  ;;  %v837_v41 = vmul.f32 %v685_v39, %v685_v39  ;;  %v749_v49 = vadd.f32 %v685_v39, %v620_v38 }
 0x19c   : > { %v878_v44 = vadd.f32 %v837_v41, %v836_v40  ;;  %v708_v40 = vld [vmem:[%s1374_s30 + $0x28] sm:$0xff]  ;;  %v806_v41 = vld [vmem:[%s1407_s8 + $0x30] sm:$0xff] }
 0x19d   : > { %876 = vadd.xlane.f32.xlu2 %v875_v42  ;;  %v802_v42 = vld [vmem:[%s1407_s8 + $0x10] sm:$0xff] }
 0x19e   : > { %747 = vadd.xlane.f32.xlu1 %v746_v43  ;;  %879 = vadd.xlane.f32.xlu0 %v878_v44 }
 0x1a1   : > { %v623_v45 = vpop.f32.mrf.mxu2  ;;  %v688_v46 = vpop.f32.mrf.mxu3 }
 0x1a2   : > { %v838_v47 = vmul.f32 %v623_v45, %v623_v45  ;;  %v839_v48 = vmul.f32 %v688_v46, %v688_v46  ;;  %v752_v50 = vadd.f32 %v688_v46, %v623_v45 }
 0x1a4   : > { %v881_v51 = vadd.f32 %v839_v48, %v838_v47 }
 0x1a5   : > { %750 = vadd.xlane.f32.xlu2 %v749_v49  ;;  %v803_v49 = vld [vmem:[%s1407_s8 + $0x18] sm:$0xff] }
 0x1a6   : > { %753 = vadd.xlane.f32.xlu0 %v752_v50  ;;  %882 = vadd.xlane.f32.xlu1 %v881_v51  ;;  %v807_v50 = vld [vmem:[%s1407_s8 + $0x38] sm:$0xff]  ;;  %v709_v51 = vld [vmem:[%s1374_s30 + $0x30] sm:$0xff] }
 0x1a9   : > { %v626_v52 = vpop.f32.mrf.mxu2  ;;  %v691_v53 = vpop.f32.mrf.mxu3 }
 0x1aa   : > { %v840_v54 = vmul.f32 %v626_v52, %v626_v52  ;;  %v841_v55 = vmul.f32 %v691_v53, %v691_v53  ;;  %v755_v56 = vadd.f32 %v691_v53, %v626_v52 }
 0x1ac   : > { %v884_v57 = vadd.f32 %v841_v55, %v840_v54 }
 0x1ae   : > { %756 = vadd.xlane.f32.xlu1 %v755_v56  ;;  %885 = vadd.xlane.f32.xlu2 %v884_v57 }
 0x1b1   : > { %v629_v59 = vpop.f32.mrf.mxu2  ;;  %v694_v60 = vpop.f32.mrf.mxu3 }
 0x1b2   : > { %v758_v61 = vadd.f32 %v694_v60, %v629_v59  ;;  %v842_v1 = vmul.f32 %v629_v59, %v629_v59  ;;  %v843_v2 = vmul.f32 %v694_v60, %v694_v60  ;;  %v711_v59 = vld [vmem:[%s1374_s30 + $0x40] sm:$0xff] }
 0x1b3   : > { %v808_v60 = vld [vmem:[%s1407_s8 + $0x40] sm:$0xff] }
 0x1b4   : > { %v887_v8 = vadd.f32 %v843_v2, %v842_v1 }
 0x1b6   : > { %759 = vadd.xlane.f32.xlu2 %v758_v61 }
 0x1b9   : > { %v632_v62 = vpop.f32.mrf.mxu2  ;;  %v697_v63 = vpop.f32.mrf.mxu3 }
 0x1ba   : > { %v761_v0 = vadd.f32 %v697_v63, %v632_v62  ;;  %v844_v10 = vmul.f32 %v632_v62, %v632_v62  ;;  %v845_v11 = vmul.f32 %v697_v63, %v697_v63 }
 0x1bc   : > { %762 = vadd.xlane.f32.xlu0 %v761_v0  ;;  %v890_v12 = vadd.f32 %v845_v11, %v844_v10 }
 0x1c1   : > { %v635_v3 = vpop.f32.mrf.mxu2  ;;  %v700_v4 = vpop.f32.mrf.mxu3 }
 0x1c2   : > { %v846_v5 = vmul.f32 %v635_v3, %v635_v3  ;;  %v764_v6 = vadd.f32 %v700_v4, %v635_v3  ;;  %v847_v7 = vmul.f32 %v700_v4, %v700_v4  ;;  %v809_v3 = vld [vmem:[%s1407_s8 + $0x48] sm:$0xff] }
 0x1c3   : > { %v712_v4 = vld [vmem:[%s1374_s30 + $0x48] sm:$0xff] }
 0x1c4   : > { %888 = vadd.xlane.f32.xlu0 %v887_v8  ;;  %765 = vadd.xlane.f32.xlu1 %v764_v6  ;;  %v893_v9 = vadd.f32 %v847_v7, %v846_v5  ;;  %v810_v5 = vld [vmem:[%s1407_s8 + $0x50] sm:$0xff] }
 0x1c6   : > { %894 = vadd.xlane.f32.xlu2 %v893_v9 }
 0x1cc   : > { %891 = vadd.xlane.f32.xlu1 %v890_v12  ;;  %v713_v12 = vld [vmem:[%s1374_s30 + $0x50] sm:$0xff] }
 0x1d8   : > { %v721_v14 = vpop.xlane.xlu2 %720 }
 0x1d9   : > { %v767_v15 = vadd.f32 %v721_v14, %v703_v13  ;;  %v714_v13 = vld [vmem:[%s1374_s30 + $0x58] sm:$0xff] }
 0x1da   : > { %v811_v14 = vld [vmem:[%s1407_s8 + $0x58] sm:$0xff] }
 0x1db   : > { %784 = vst.msk [vmem:[%s1374_s30] sm:$0xff] %vm270_vm3, %v767_v15 }
 0x1e0   : > { %v850_v18 = vpop.xlane.xlu2 %849  ;;  %v724_v19 = vpop.xlane.xlu0 %723 }
 0x1e1   : > { %v896_v22 = vadd.f32 %v850_v18, %v800_v16  ;;  %v768_v20 = vadd.f32 %v724_v19, %v704_v17 }
 0x1e3   : > { %912 = vst.msk [vmem:[%s1407_s8] sm:$0xff] %vm270_vm3, %v896_v22 }
 0x1e4   : > { %785 = vst.msk [vmem:[%s1374_s30 + $0x8] sm:$0xff] %vm270_vm3, %v768_v20  ;;  %v715_v20 = vld [vmem:[%s1374_s30 + $0x60] sm:$0xff] }
 0x1e8   : > { %v733_v25 = vpop.xlane.xlu2 %732  ;;  %v862_v26 = vpop.xlane.xlu0 %861 }
 0x1e9   : > { %v771_v27 = vadd.f32 %v733_v25, %v707_v23  ;;  %v900_v28 = vadd.f32 %v862_v26, %v804_v21  ;;  %v727_v29 = vpop.xlane.xlu1 %726  ;;  %v812_v23 = vld [vmem:[%s1407_s8 + $0x60] sm:$0xff] }
 0x1ea   : > { %v769_v30 = vadd.f32 %v727_v29, %v705_v24 }
 0x1eb   : > { %788 = vst.msk [vmem:[%s1374_s30 + $0x20] sm:$0xff] %vm270_vm3, %v771_v27  ;;  %v716_v27 = vld [vmem:[%s1374_s30 + $0x68] sm:$0xff] }
 0x1ec   : > { %916 = vst.msk [vmem:[%s1407_s8 + $0x20] sm:$0xff] %vm270_vm3, %v900_v28 }
 0x1ed   : > { %786 = vst.msk [vmem:[%s1374_s30 + $0x10] sm:$0xff] %vm270_vm3, %v769_v30  ;;  %v717_v30 = vld [vmem:[%s1374_s30 + $0x70] sm:$0xff] }
 0x1f0   : > { %v853_v34 = vpop.xlane.xlu0 %852  ;;  %v730_v35 = vpop.xlane.xlu2 %729 }
 0x1f1   : > { %v897_v36 = vadd.f32 %v853_v34, %v801_v31  ;;  %v865_v37 = vpop.xlane.xlu1 %864  ;;  %v770_v38 = vadd.f32 %v730_v35, %v706_v32  ;;  %v718_v34 = vld [vmem:[%s1374_s30 + $0x78] sm:$0xff] }
 0x1f2   : > { %v901_v39 = vadd.f32 %v865_v37, %v805_v33  ;;  %v813_v33 = vld [vmem:[%s1407_s8 + $0x68] sm:$0xff]  ;;  %v815_v37 = vld [vmem:[%s1407_s8 + $0x78] sm:$0xff] }
 0x1f3   : > { %913 = vst.msk [vmem:[%s1407_s8 + $0x8] sm:$0xff] %vm270_vm3, %v897_v36 }
 0x1f4   : > { %917 = vst.msk [vmem:[%s1407_s8 + $0x28] sm:$0xff] %vm270_vm3, %v901_v39 }
 0x1f5   : > { %787 = vst.msk [vmem:[%s1374_s30 + $0x18] sm:$0xff] %vm270_vm3, %v770_v38 }
 0x1f8   : > { %v736_v43 = vpop.xlane.xlu0 %735  ;;  %v868_v44 = vpop.xlane.xlu2 %867 }
 0x1f9   : > { %v772_v45 = vadd.f32 %v736_v43, %v708_v40  ;;  %v856_v46 = vpop.xlane.xlu1 %855  ;;  %v902_v47 = vadd.f32 %v868_v44, %v806_v41 }
 0x1fa   : > { %v898_v48 = vadd.f32 %v856_v46, %v802_v42  ;;  %v814_v42 = vld [vmem:[%s1407_s8 + $0x70] sm:$0xff] }
 0x1fb   : > { %789 = vst.msk [vmem:[%s1374_s30 + $0x28] sm:$0xff] %vm270_vm3, %v772_v45 }
 0x1fc   : > { %914 = vst.msk [vmem:[%s1407_s8 + $0x10] sm:$0xff] %vm270_vm3, %v898_v48 }
 0x1fd   : > { %918 = vst.msk [vmem:[%s1407_s8 + $0x30] sm:$0xff] %vm270_vm3, %v902_v47 }
 0x200   : > { %v859_v52 = vpop.xlane.xlu2 %858  ;;  %v871_v53 = vpop.xlane.xlu0 %870 }
 0x201   : > { %v739_v54 = vpop.xlane.xlu1 %738  ;;  %v899_v55 = vadd.f32 %v859_v52, %v803_v49  ;;  %v903_v56 = vadd.f32 %v871_v53, %v807_v50 }
 0x202   : > { %v773_v57 = vadd.f32 %v739_v54, %v709_v51 }
 0x203   : > { %915 = vst.msk [vmem:[%s1407_s8 + $0x18] sm:$0xff] %vm270_vm3, %v899_v55 }
 0x204   : > { %790 = vst.msk [vmem:[%s1374_s30 + $0x30] sm:$0xff] %vm270_vm3, %v773_v57 }
 0x205   : > { %919 = vst.msk [vmem:[%s1407_s8 + $0x38] sm:$0xff] %vm270_vm3, %v903_v56 }
 0x208   : > { %v742_v61 = vpop.xlane.xlu2 %741  ;;  %v745_v62 = vpop.xlane.xlu0 %744 }
 0x209   : > { %v774_v63 = vadd.f32 %v742_v61, %v710_v58  ;;  %v775_v0 = vadd.f32 %v745_v62, %v711_v59  ;;  %v874_v1 = vpop.xlane.xlu1 %873 }
 0x20a   : > { %v904_v2 = vadd.f32 %v874_v1, %v808_v60 }
 0x20b   : > { %791 = vst.msk [vmem:[%s1374_s30 + $0x38] sm:$0xff] %vm270_vm3, %v774_v63 }
 0x20c   : > { %792 = vst.msk [vmem:[%s1374_s30 + $0x40] sm:$0xff] %vm270_vm3, %v775_v0 }
 0x20d   : > { %920 = vst.msk [vmem:[%s1407_s8 + $0x40] sm:$0xff] %vm270_vm3, %v904_v2 }
 0x210   : > { %v877_v6 = vpop.xlane.xlu2 %876 }
 0x211   : > { %v748_v7 = vpop.xlane.xlu1 %747  ;;  %v905_v8 = vadd.f32 %v877_v6, %v809_v3  ;;  %v880_v9 = vpop.xlane.xlu0 %879 }
 0x212   : > { %v776_v10 = vadd.f32 %v748_v7, %v712_v4  ;;  %v906_v11 = vadd.f32 %v880_v9, %v810_v5 }
 0x213   : > { %921 = vst.msk [vmem:[%s1407_s8 + $0x48] sm:$0xff] %vm270_vm3, %v905_v8 }
 0x214   : > { %793 = vst.msk [vmem:[%s1374_s30 + $0x48] sm:$0xff] %vm270_vm3, %v776_v10 }
 0x215   : > { %922 = vst.msk [vmem:[%s1407_s8 + $0x50] sm:$0xff] %vm270_vm3, %v906_v11 }
 0x218   : > { %v751_v15 = vpop.xlane.xlu2 %750 }
 0x219   : > { %v777_v16 = vadd.f32 %v751_v15, %v713_v12  ;;  %v754_v17 = vpop.xlane.xlu0 %753  ;;  %v883_v18 = vpop.xlane.xlu1 %882 }
 0x21a   : > { %v778_v19 = vadd.f32 %v754_v17, %v714_v13  ;;  %v907_v22 = vadd.f32 %v883_v18, %v811_v14 }
 0x21b   : > { %794 = vst.msk [vmem:[%s1374_s30 + $0x50] sm:$0xff] %vm270_vm3, %v777_v16 }
 0x21c   : > { %795 = vst.msk [vmem:[%s1374_s30 + $0x58] sm:$0xff] %vm270_vm3, %v778_v19 }
 0x21d   : > { %923 = vst.msk [vmem:[%s1407_s8 + $0x58] sm:$0xff] %vm270_vm3, %v907_v22 }
 0x221   : > { %v757_v21 = vpop.xlane.xlu1 %756  ;;  %v886_v24 = vpop.xlane.xlu2 %885 }
 0x222   : > { %v779_v25 = vadd.f32 %v757_v21, %v715_v20  ;;  %v908_v26 = vadd.f32 %v886_v24, %v812_v23 }
 0x224   : > { %796 = vst.msk [vmem:[%s1374_s30 + $0x60] sm:$0xff] %vm270_vm3, %v779_v25 }
 0x225   : > { %924 = vst.msk [vmem:[%s1407_s8 + $0x60] sm:$0xff] %vm270_vm3, %v908_v26 }
 0x229   : > { %v760_v28 = vpop.xlane.xlu2 %759 }
 0x22a   : > { %v780_v29 = vadd.f32 %v760_v28, %v716_v27 }
 0x22c   : > { %797 = vst.msk [vmem:[%s1374_s30 + $0x68] sm:$0xff] %vm270_vm3, %v780_v29 }
 0x22f   : > { %v763_v31 = vpop.xlane.xlu0 %762 }
 0x230   : > { %v781_v32 = vadd.f32 %v763_v31, %v717_v30 }
 0x232   : > { %798 = vst.msk [vmem:[%s1374_s30 + $0x70] sm:$0xff] %vm270_vm3, %v781_v32 }
 0x237   : > { %v889_v35 = vpop.xlane.xlu0 %888  ;;  %v766_v36 = vpop.xlane.xlu1 %765 }
 0x238   : > { %v909_v38 = vadd.f32 %v889_v35, %v813_v33  ;;  %v782_v39 = vadd.f32 %v766_v36, %v718_v34 }
 0x239   : > { %v895_v40 = vpop.xlane.xlu2 %894 }
 0x23a   : > { %925 = vst.msk [vmem:[%s1407_s8 + $0x68] sm:$0xff] %vm270_vm3, %v909_v38  ;;  %v911_v41 = vadd.f32 %v895_v40, %v815_v37 }
 0x23b   : > { %799 = vst.msk [vmem:[%s1374_s30 + $0x78] sm:$0xff] %vm270_vm3, %v782_v39 }
 0x23c   : > { %927 = vst.msk [vmem:[%s1407_s8 + $0x78] sm:$0xff] %vm270_vm3, %v911_v41 }
 0x23f   : > { %v892_v43 = vpop.xlane.xlu1 %891 }
 0x240   : > { %v910_v44 = vadd.f32 %v892_v43, %v814_v42 }
 0x242   : > { %926 = vst.msk [vmem:[%s1407_s8 + $0x70] sm:$0xff] %vm270_vm3, %v910_v44 }
 0x243 PF: > { %s16_s20 = sadd.s32 1, %s1163_s20   ;;  %s1558_s18 = smov %s1159_s19 }
 0x244   : > { %p13_p5 = scmp.ge.s32.totalorder %s16_s20, 4   ;;  %s1559_s19 = smov %s1561_s21 }
 0x246   :  { %15 = sbr.rel (!%p13_p5) target bundleno = 2 (0x2), region = 82 }

</bundles_post_ra>
